<compile_context>
chip_gen: v7x
topology: tpu7x:2x2x1
jax: 0.10.0
libtpu: 0.0.40
codegen_flags: <defaults>
</compile_context>

<pallas_src>
import functools
import math

import jax
import jax.numpy as jnp
from jax.experimental import pallas as pl
from jax.experimental.pallas import tpu as pltpu


# ----------------------------------------------------------------------------
# Helpers
# ----------------------------------------------------------------------------

def _round_up(x, m):
    return ((x + m - 1) // m) * m


def _pad2(a, rows, cols):
    r, c = a.shape
    if r == rows and c == cols:
        return a
    return jnp.pad(a, ((0, rows - r), (0, cols - c)))


def _row_tile(M):
    # sublane-aligned row tile; full (padded) extent for small M, 256 otherwise
    return 256 if M > 256 else _round_up(M, 8)


def _col_tile(N):
    # lane-dense column tile (multiple of 128)
    return 256 if N > 256 else _round_up(N, 128)


def _k_tile(K):
    return 512 if K > 512 else _round_up(K, 128)


# ----------------------------------------------------------------------------
# Kernel 1: tiled linear  y = relu?(x @ W + b)
# ----------------------------------------------------------------------------

def _linear_kernel(x_ref, w_ref, b_ref, o_ref, acc_ref, *, activation):
    k = pl.program_id(2)

    @pl.when(k == 0)
    def _():
        acc_ref[...] = jnp.zeros_like(acc_ref)

    acc_ref[...] += jnp.dot(
        x_ref[...].astype(jnp.bfloat16),
        w_ref[...].astype(jnp.bfloat16),
        preferred_element_type=jnp.float32,
    )

    @pl.when(k == pl.num_programs(2) - 1)
    def _():
        y = acc_ref[...] + b_ref[...]          # epilogue stays in f32
        if activation == "relu":
            y = jnp.maximum(y, 0.0)
        o_ref[...] = y.astype(o_ref.dtype)


def linear(x2d, w, b, activation=None):
    """x2d: (M, K) @ w: (K, N) + b: (1, N) -> (M, N). bf16 MXU, f32 accumulate."""
    M, K = x2d.shape
    N = w.shape[1]
    tm, tn, tk = _row_tile(M), _col_tile(N), _k_tile(K)
    Mp, Np, Kp = _round_up(M, tm), _round_up(N, tn), _round_up(K, tk)

    xp = _pad2(x2d, Mp, Kp)
    wp = _pad2(w, Kp, Np)
    bp = _pad2(b, 1, Np)

    out = pl.pallas_call(
        functools.partial(_linear_kernel, activation=activation),
        out_shape=jax.ShapeDtypeStruct((Mp, Np), jnp.float32),
        grid_spec=pltpu.PrefetchScalarGridSpec(
            num_scalar_prefetch=0,
            grid=(Mp // tm, Np // tn, Kp // tk),
            in_specs=[
                pl.BlockSpec((tm, tk), lambda i, j, k: (i, k)),
                pl.BlockSpec((tk, tn), lambda i, j, k: (k, j)),
                pl.BlockSpec((1, tn), lambda i, j, k: (0, j)),
            ],
            out_specs=pl.BlockSpec((tm, tn), lambda i, j, k: (i, j)),
            scratch_shapes=[pltpu.VMEM((tm, tn), jnp.float32)],
        ),
        compiler_params=pltpu.CompilerParams(
            dimension_semantics=("parallel", "parallel", "arbitrary")),
    )(xp, wp, bp)

    if (Mp, Np) != (M, N):
        out = out[:M, :N]
    return out


# ----------------------------------------------------------------------------
# Kernel 2: fused  LayerNorm( resid + (x @ W + b) ) * gamma + beta
#   (used for the attention output projection + residual + LN, and for the
#    second FFN linear + residual + LN — removes 2 full-activation HBM
#    round-trips per sublayer)
# ----------------------------------------------------------------------------

def _lin_res_ln_kernel(x_ref, w_ref, b_ref, r_ref, g_ref, bt_ref, o_ref,
                       acc_ref, *, eps):
    k = pl.program_id(1)

    @pl.when(k == 0)
    def _():
        acc_ref[...] = jnp.zeros_like(acc_ref)

    acc_ref[...] += jnp.dot(
        x_ref[...].astype(jnp.bfloat16),
        w_ref[...].astype(jnp.bfloat16),
        preferred_element_type=jnp.float32,
    )

    @pl.when(k == pl.num_programs(1) - 1)
    def _():
        z = acc_ref[...] + b_ref[...] + r_ref[...]
        mean = jnp.mean(z, axis=-1, keepdims=True)
        var = jnp.mean((z - mean) ** 2, axis=-1, keepdims=True)
        zn = (z - mean) * jax.lax.rsqrt(var + eps)
        o_ref[...] = (zn * g_ref[...] + bt_ref[...]).astype(o_ref.dtype)


def linear_residual_layernorm(x2d, w, b, resid2d, gamma, beta, eps=1e-5):
    """LN(resid + x @ W + b).  x2d: (M, K), w: (K, D), resid: (M, D).
    The D axis is kept whole (LayerNorm reduces over it)."""
    M, K = x2d.shape
    D = w.shape[1]
    tm, tk = _row_tile(M), _k_tile(K)
    Mp, Kp = _round_up(M, tm), _round_up(K, tk)

    xp = _pad2(x2d, Mp, Kp)
    wp = _pad2(w, Kp, D)
    rp = _pad2(resid2d, Mp, D)

    out = pl.pallas_call(
        functools.partial(_lin_res_ln_kernel, eps=eps),
        out_shape=jax.ShapeDtypeStruct((Mp, D), jnp.float32),
        grid_spec=pltpu.PrefetchScalarGridSpec(
            num_scalar_prefetch=0,
            grid=(Mp // tm, Kp // tk),
            in_specs=[
                pl.BlockSpec((tm, tk), lambda i, k: (i, k)),
                pl.BlockSpec((tk, D), lambda i, k: (k, 0)),
                pl.BlockSpec((1, D), lambda i, k: (0, 0)),
                pl.BlockSpec((tm, D), lambda i, k: (i, 0)),
                pl.BlockSpec((1, D), lambda i, k: (0, 0)),
                pl.BlockSpec((1, D), lambda i, k: (0, 0)),
            ],
            out_specs=pl.BlockSpec((tm, D), lambda i, k: (i, 0)),
            scratch_shapes=[pltpu.VMEM((tm, D), jnp.float32)],
        ),
        compiler_params=pltpu.CompilerParams(
            dimension_semantics=("parallel", "arbitrary")),
    )(xp, wp, b, rp, gamma, beta)

    if Mp != M:
        out = out[:M]
    return out


# ----------------------------------------------------------------------------
# Kernel 3: head-batched multi-head attention
#   grid=(B,), per program all H heads on the [S, H*Dh] layout (no transposes),
#   dot_general contracts Dh directly (no k.T), causal mask built once per
#   program, f32 softmax with EUP approx reciprocal.
# ----------------------------------------------------------------------------

def _mha_kernel(q_ref, k_ref, v_ref, o_ref, *, num_heads, scale, causal):
    Sq, D = q_ref.shape
    Sk = k_ref.shape[0]
    Dh = D // num_heads

    if causal:
        row = jax.lax.broadcasted_iota(jnp.int32, (Sq, Sk), 0)
        col = jax.lax.broadcasted_iota(jnp.int32, (Sq, Sk), 1)
        add_mask = jnp.where(col <= row, 0.0, -1e30).astype(jnp.float32)

    for h in range(num_heads):                    # static unroll over heads
        sl = slice(h * Dh, (h + 1) * Dh)
        qh = q_ref[:, sl].astype(jnp.bfloat16)
        kh = k_ref[:, sl].astype(jnp.bfloat16)
        vh = v_ref[:, sl].astype(jnp.bfloat16)

        s = jax.lax.dot_general(
            qh, kh, (((1,), (1,)), ((), ())),
            preferred_element_type=jnp.float32) * scale   # (Sq, Sk), f32
        if causal:
            s = s + add_mask

        m = jnp.max(s, axis=-1, keepdims=True)
        p = jnp.exp(s - m)
        denom = jnp.sum(p, axis=-1, keepdims=True)
        p = p * pl.reciprocal(denom, approx=True)

        oh = jax.lax.dot_general(
            p.astype(jnp.bfloat16), vh, (((1,), (0,)), ((), ())),
            preferred_element_type=jnp.float32)
        o_ref[:, sl] = oh.astype(o_ref.dtype)


def mha(q, k, v, num_heads, causal):
    """q: (B, Sq, D), k/v: (B, Sk, D) with D = H * Dh -> (B, Sq, D)."""
    B, Sq, D = q.shape
    Sk = k.shape[1]
    scale = 1.0 / math.sqrt(D // num_heads)
    return pl.pallas_call(
        functools.partial(_mha_kernel, num_heads=num_heads, scale=scale,
                          causal=causal),
        out_shape=jax.ShapeDtypeStruct((B, Sq, D), jnp.float32),
        grid=(B,),
        in_specs=[
            pl.BlockSpec((None, Sq, D), lambda b: (b, 0, 0)),
            pl.BlockSpec((None, Sk, D), lambda b: (b, 0, 0)),
            pl.BlockSpec((None, Sk, D), lambda b: (b, 0, 0)),
        ],
        out_specs=pl.BlockSpec((None, Sq, D), lambda b: (b, 0, 0)),
        compiler_params=pltpu.CompilerParams(
            dimension_semantics=("parallel",)),
    )(q, k, v)


# ----------------------------------------------------------------------------
# Transformer layers (glue in plain JAX; all heavy math in the 3 kernels above)
# ----------------------------------------------------------------------------

def encoder_layer(x, p, num_heads):
    B, S, D = x.shape
    x2 = x.reshape(B * S, D)

    sa = p["self_attn"]
    qkv = linear(x2, sa["w_qkv"], sa["b_qkv"]).reshape(B, S, 3 * D)
    q, k, v = qkv[..., :D], qkv[..., D:2 * D], qkv[..., 2 * D:]
    attn = mha(q, k, v, num_heads, causal=False).reshape(B * S, D)
    x2 = linear_residual_layernorm(attn, sa["wo"], sa["bo"],
                                   x2, p["ln1_g"], p["ln1_b"])

    h = linear(x2, p["ffn"]["w1"], p["ffn"]["b1"], activation="relu")
    x2 = linear_residual_layernorm(h, p["ffn"]["w2"], p["ffn"]["b2"],
                                   x2, p["ln2_g"], p["ln2_b"])
    return x2.reshape(B, S, D)


def decoder_layer(x, enc_ctx, p, num_heads):
    B, S, D = x.shape
    Se = enc_ctx.shape[1]
    x2 = x.reshape(B * S, D)

    # masked self-attention
    sa = p["self_attn"]
    qkv = linear(x2, sa["w_qkv"], sa["b_qkv"]).reshape(B, S, 3 * D)
    q, k, v = qkv[..., :D], qkv[..., D:2 * D], qkv[..., 2 * D:]
    attn = mha(q, k, v, num_heads, causal=True).reshape(B * S, D)
    x2 = linear_residual_layernorm(attn, sa["wo"], sa["bo"],
                                   x2, p["ln1_g"], p["ln1_b"])

    # cross-attention against encoder context
    ca = p["cross_attn"]
    q = linear(x2, ca["wq"], ca["bq"]).reshape(B, S, D)
    kv = linear(enc_ctx.reshape(B * Se, D), ca["w_kv"], ca["b_kv"]).reshape(B, Se, 2 * D)
    k, v = kv[..., :D], kv[..., D:]
    attn = mha(q, k, v, num_heads, causal=False).reshape(B * S, D)
    x2 = linear_residual_layernorm(attn, ca["wo"], ca["bo"],
                                   x2, p["ln2_g"], p["ln2_b"])

    # feed-forward
    h = linear(x2, p["ffn"]["w1"], p["ffn"]["b1"], activation="relu")
    x2 = linear_residual_layernorm(h, p["ffn"]["w2"], p["ffn"]["b2"],
                                   x2, p["ln3_g"], p["ln3_b"])
    return x2.reshape(B, S, D)


def transformer_forward(params, encoder_inputs, decoder_inputs, num_heads):
    enc_ctx = encoder_inputs
    for p in params["encoders"]:
        enc_ctx = encoder_layer(enc_ctx, p, num_heads)
    dec = decoder_inputs
    for p in params["decoders"]:
        dec = decoder_layer(dec, enc_ctx, p, num_heads)
    B, S, D = dec.shape
    out = linear(dec.reshape(B * S, D), params["w_out"], params["b_out"])
    return out.reshape(B, S, params["w_out"].shape[1])


# ----------------------------------------------------------------------------
# Deterministic parameter initialization (QKV / KV weights pre-concatenated
# so the projections run as single fused matmuls)
# ----------------------------------------------------------------------------

def _init_linear(key, d_in, d_out):
    w = jax.random.normal(key, (d_in, d_out), jnp.float32) * 0.02
    b = jnp.zeros((1, d_out), jnp.float32)
    return w, b


def _init_mha(key, d, cross=False):
    ks = jax.random.split(key, 4)
    wq, bq = _init_linear(ks[0], d, d)
    wk, bk = _init_linear(ks[1], d, d)
    wv, bv = _init_linear(ks[2], d, d)
    wo, bo = _init_linear(ks[3], d, d)
    if cross:
        return dict(wq=wq, bq=bq,
                    w_kv=jnp.concatenate([wk, wv], axis=1),
                    b_kv=jnp.concatenate([bk, bv], axis=1),
                    wo=wo, bo=bo)
    return dict(w_qkv=jnp.concatenate([wq, wk, wv], axis=1),
                b_qkv=jnp.concatenate([bq, bk, bv], axis=1),
                wo=wo, bo=bo)


def _init_ffn(key, d, d_ff):
    k1, k2 = jax.random.split(key)
    w1, b1 = _init_linear(k1, d, d_ff)
    w2, b2 = _init_linear(k2, d_ff, d)
    return dict(w1=w1, b1=b1, w2=w2, b2=b2)


def _ln_params(d):
    return jnp.ones((1, d), jnp.float32), jnp.zeros((1, d), jnp.float32)


def init_transformer_params(key, size, final_out_size, n_layers, d_ff):
    keys = jax.random.split(key, 2 * n_layers + 1)
    encoders, decoders = [], []
    for i in range(n_layers):
        k_attn, k_ffn = jax.random.split(keys[i])
        g1, b1 = _ln_params(size)
        g2, b2 = _ln_params(size)
        encoders.append(dict(self_attn=_init_mha(k_attn, size),
                             ffn=_init_ffn(k_ffn, size, d_ff),
                             ln1_g=g1, ln1_b=b1, ln2_g=g2, ln2_b=b2))
    for i in range(n_layers):
        k_self, k_cross, k_ffn = jax.random.split(keys[n_layers + i], 3)
        g1, b1 = _ln_params(size)
        g2, b2 = _ln_params(size)
        g3, b3 = _ln_params(size)
        decoders.append(dict(self_attn=_init_mha(k_self, size),
                             cross_attn=_init_mha(k_cross, size, cross=True),
                             ffn=_init_ffn(k_ffn, size, d_ff),
                             ln1_g=g1, ln1_b=b1, ln2_g=g2, ln2_b=b2,
                             ln3_g=g3, ln3_b=b3))
    w_out, b_out = _init_linear(keys[-1], size, final_out_size)
    return dict(encoders=encoders, decoders=decoders, w_out=w_out, b_out=b_out)


# ----------------------------------------------------------------------------
# Main
# ----------------------------------------------------------------------------

if __name__ == "__main__":
    # Small shapes consistent with the module's forward:
    size = 32            # model dim
    final_out_size = 16
    n_layers = 2
    num_heads = 4
    d_ff = 4 * size      # standard FFN expansion from the referenced paper
    B, S = 2, 8          # batch, sequence length (enc and dec use same S here)

    key = jax.random.PRNGKey(0)
    k_params, k_enc, k_dec = jax.random.split(key, 3)
    params = init_transformer_params(k_params, size, final_out_size, n_layers, d_ff)

    encoder_inputs = jax.random.normal(k_enc, (B, S, size), jnp.float32)
    decoder_inputs = jax.random.normal(k_dec, (B, S, size), jnp.float32)

    fwd = jax.jit(functools.partial(transformer_forward, num_heads=num_heads))
    out = fwd(params, encoder_inputs, decoder_inputs)
    out = jax.block_until_ready(out)

    assert out.shape == (B, S, final_out_size), out.shape
    assert bool(jnp.all(jnp.isfinite(out)))
    print("KERNEL_OK")
</pallas_src>

<mosaic_0001>
module attributes {stable_mosaic.version = 11 : i64} {
  func.func @_linear_kernel(%arg0: i32, %arg1: i32, %arg2: i32, %arg3: memref<16x128xf32, #tpu.memory_space<vmem>>, %arg4: memref<128x128xf32, #tpu.memory_space<vmem>>, %arg5: memref<1x128xf32, #tpu.memory_space<vmem>>, %arg6: memref<16x128xf32, #tpu.memory_space<vmem>>, %arg7: memref<16x128xf32, #tpu.memory_space<vmem>>) attributes {dimension_semantics = [#tpu.dimension_semantics<parallel>, #tpu.dimension_semantics<parallel>, #tpu.dimension_semantics<arbitrary>], iteration_bounds = array<i64: 1, 1, 1>, scalar_prefetch = 0 : i64, scratch_operands = 1 : i64, tpu.core_type = #tpu.core_type<tc>, window_params = [{transform_indices = @transform_0, window_bounds = array<i64: 16, 128>}, {transform_indices = @transform_1, window_bounds = array<i64: 128, 128>}, {transform_indices = @transform_2, window_bounds = array<i64: 1, 128>}, {transform_indices = @transform_3, window_bounds = array<i64: 16, 128>}]} {
    %c0_i32 = arith.constant 0 : i32
    %0 = arith.cmpi eq, %arg2, %c0_i32 : i32
    %1 = arith.extui %0 : i1 to i32
    %c0_i32_0 = arith.constant 0 : i32
    %2 = arith.cmpi ne, %1, %c0_i32_0 : i32
    scf.if %2 {
      %cst_10 = arith.constant 0.000000e+00 : f32
      %14 = vector.broadcast %cst_10 : f32 to vector<16x128xf32>
      %c0_11 = arith.constant 0 : index
      %c0_12 = arith.constant 0 : index
      %15 = vector.load %arg7[%c0_11, %c0_12] : memref<16x128xf32, #tpu.memory_space<vmem>>, vector<16x128xf32>
      tpu.vector_store %arg7[%c0_11, %c0_12], %14 {strides = array<i32>} : memref<16x128xf32, #tpu.memory_space<vmem>>, vector<16x128xf32>,
    } else {
    }
    %c0 = arith.constant 0 : index
    %c0_1 = arith.constant 0 : index
    %3 = vector.load %arg7[%c0, %c0_1] : memref<16x128xf32, #tpu.memory_space<vmem>>, vector<16x128xf32>
    %c0_2 = arith.constant 0 : index
    %c0_3 = arith.constant 0 : index
    %4 = vector.load %arg3[%c0_2, %c0_3] : memref<16x128xf32, #tpu.memory_space<vmem>>, vector<16x128xf32>
    %5 = arith.truncf %4 : vector<16x128xf32> to vector<16x128xbf16>
    %c0_4 = arith.constant 0 : index
    %c0_5 = arith.constant 0 : index
    %6 = vector.load %arg4[%c0_4, %c0_5] : memref<128x128xf32, #tpu.memory_space<vmem>>, vector<128x128xf32>
    %7 = arith.truncf %6 : vector<128x128xf32> to vector<128x128xbf16>
    %cst = arith.constant dense<0.000000e+00> : vector<16x128xf32>
    %8 = tpu.matmul %5, %7, %cst {dimension_numbers = #tpu.dot_dimension_numbers<[1], [0], [0], [1], [0, 0, 1, 1], [], []>} : vector<16x128xbf16>, vector<128x128xbf16>, vector<16x128xf32> -> vector<16x128xf32>
    %9 = arith.addf %3, %8 : vector<16x128xf32>
    %c0_6 = arith.constant 0 : index
    %c0_7 = arith.constant 0 : index
    %10 = vector.load %arg7[%c0_6, %c0_7] : memref<16x128xf32, #tpu.memory_space<vmem>>, vector<16x128xf32>
    tpu.vector_store %arg7[%c0_6, %c0_7], %9 {strides = array<i32>} : memref<16x128xf32, #tpu.memory_space<vmem>>, vector<16x128xf32>,
    %c0_i32_8 = arith.constant 0 : i32
    %11 = arith.cmpi eq, %arg2, %c0_i32_8 : i32
    %12 = arith.extui %11 : i1 to i32
    %c0_i32_9 = arith.constant 0 : i32
    %13 = arith.cmpi ne, %12, %c0_i32_9 : i32
    scf.if %13 {
      %c0_10 = arith.constant 0 : index
      %c0_11 = arith.constant 0 : index
      %14 = vector.load %arg7[%c0_10, %c0_11] : memref<16x128xf32, #tpu.memory_space<vmem>>, vector<16x128xf32>
      %c0_12 = arith.constant 0 : index
      %c0_13 = arith.constant 0 : index
      %15 = vector.load %arg5[%c0_12, %c0_13] : memref<1x128xf32, #tpu.memory_space<vmem>>, vector<1x128xf32>
      %16 = vector.broadcast %15 : vector<1x128xf32> to vector<16x128xf32>
      %17 = arith.addf %14, %16 : vector<16x128xf32>
      %c0_14 = arith.constant 0 : index
      %c0_15 = arith.constant 0 : index
      %18 = vector.load %arg6[%c0_14, %c0_15] : memref<16x128xf32, #tpu.memory_space<vmem>>, vector<16x128xf32>
      tpu.vector_store %arg6[%c0_14, %c0_15], %17 {strides = array<i32>} : memref<16x128xf32, #tpu.memory_space<vmem>>, vector<16x128xf32>,
    } else {
    }
    return
  }
  func.func @transform_0(%arg0: i32, %arg1: i32, %arg2: i32) -> (i32, i32) {
    %c0_i32 = arith.constant 0 : i32
    return %arg0, %arg2 : i32, i32
  }
  func.func @transform_1(%arg0: i32, %arg1: i32, %arg2: i32) -> (i32, i32) {
    %c0_i32 = arith.constant 0 : i32
    return %arg2, %arg1 : i32, i32
  }
  func.func @transform_2(%arg0: i32, %arg1: i32, %arg2: i32) -> (i32, i32) {
    %c0_i32 = arith.constant 0 : i32
    %c0_i32_0 = arith.constant 0 : i32
    return %c0_i32, %arg1 : i32, i32
  }
  func.func @transform_3(%arg0: i32, %arg1: i32, %arg2: i32) -> (i32, i32) {
    %c0_i32 = arith.constant 0 : i32
    return %arg0, %arg1 : i32, i32
  }
}

module attributes {stable_mosaic.version = 11 : i64} {
  func.func @_lin_res_ln_kernel(%arg0: i32, %arg1: i32, %arg2: memref<16x128xf32, #tpu.memory_space<vmem>>, %arg3: memref<128x32xf32, #tpu.memory_space<vmem>>, %arg4: memref<1x32xf32, #tpu.memory_space<vmem>>, %arg5: memref<16x32xf32, #tpu.memory_space<vmem>>, %arg6: memref<1x32xf32, #tpu.memory_space<vmem>>, %arg7: memref<1x32xf32, #tpu.memory_space<vmem>>, %arg8: memref<16x32xf32, #tpu.memory_space<vmem>>, %arg9: memref<16x32xf32, #tpu.memory_space<vmem>>) attributes {dimension_semantics = [#tpu.dimension_semantics<parallel>, #tpu.dimension_semantics<arbitrary>], iteration_bounds = array<i64: 1, 1>, scalar_prefetch = 0 : i64, scratch_operands = 1 : i64, tpu.core_type = #tpu.core_type<tc>, window_params = [{transform_indices = @transform_0, window_bounds = array<i64: 16, 128>}, {transform_indices = @transform_1, window_bounds = array<i64: 128, 32>}, {pipeline_mode = #tpu.pipeline_mode<synchronous>, transform_indices = @transform_2, window_bounds = array<i64: 1, 32>}, {transform_indices = @transform_3, window_bounds = array<i64: 16, 32>}, {pipeline_mode = #tpu.pipeline_mode<synchronous>, transform_indices = @transform_4, window_bounds = array<i64: 1, 32>}, {pipeline_mode = #tpu.pipeline_mode<synchronous>, transform_indices = @transform_5, window_bounds = array<i64: 1, 32>}, {transform_indices = @transform_6, window_bounds = array<i64: 16, 32>}]} {
    %c0_i32 = arith.constant 0 : i32
    %0 = arith.cmpi eq, %arg1, %c0_i32 : i32
    %1 = arith.extui %0 : i1 to i32
    %c0_i32_0 = arith.constant 0 : i32
    %2 = arith.cmpi ne, %1, %c0_i32_0 : i32
    scf.if %2 {
      %cst_10 = arith.constant 0.000000e+00 : f32
      %14 = vector.broadcast %cst_10 : f32 to vector<16x32xf32>
      %c0_11 = arith.constant 0 : index
      %c0_12 = arith.constant 0 : index
      %15 = vector.load %arg9[%c0_11, %c0_12] : memref<16x32xf32, #tpu.memory_space<vmem>>, vector<16x32xf32>
      tpu.vector_store %arg9[%c0_11, %c0_12], %14 {strides = array<i32>} : memref<16x32xf32, #tpu.memory_space<vmem>>, vector<16x32xf32>,
    } else {
    }
    %c0 = arith.constant 0 : index
    %c0_1 = arith.constant 0 : index
    %3 = vector.load %arg9[%c0, %c0_1] : memref<16x32xf32, #tpu.memory_space<vmem>>, vector<16x32xf32>
    %c0_2 = arith.constant 0 : index
    %c0_3 = arith.constant 0 : index
    %4 = vector.load %arg2[%c0_2, %c0_3] : memref<16x128xf32, #tpu.memory_space<vmem>>, vector<16x128xf32>
    %5 = arith.truncf %4 : vector<16x128xf32> to vector<16x128xbf16>
    %c0_4 = arith.constant 0 : index
    %c0_5 = arith.constant 0 : index
    %6 = vector.load %arg3[%c0_4, %c0_5] : memref<128x32xf32, #tpu.memory_space<vmem>>, vector<128x32xf32>
    %7 = arith.truncf %6 : vector<128x32xf32> to vector<128x32xbf16>
    %cst = arith.constant dense<0.000000e+00> : vector<16x32xf32>
    %8 = tpu.matmul %5, %7, %cst {dimension_numbers = #tpu.dot_dimension_numbers<[1], [0], [0], [1], [0, 0, 1, 1], [], []>} : vector<16x128xbf16>, vector<128x32xbf16>, vector<16x32xf32> -> vector<16x32xf32>
    %9 = arith.addf %3, %8 : vector<16x32xf32>
    %c0_6 = arith.constant 0 : index
    %c0_7 = arith.constant 0 : index
    %10 = vector.load %arg9[%c0_6, %c0_7] : memref<16x32xf32, #tpu.memory_space<vmem>>, vector<16x32xf32>
    tpu.vector_store %arg9[%c0_6, %c0_7], %9 {strides = array<i32>} : memref<16x32xf32, #tpu.memory_space<vmem>>, vector<16x32xf32>,
    %c0_i32_8 = arith.constant 0 : i32
    %11 = arith.cmpi eq, %arg1, %c0_i32_8 : i32
    %12 = arith.extui %11 : i1 to i32
    %c0_i32_9 = arith.constant 0 : i32
    %13 = arith.cmpi ne, %12, %c0_i32_9 : i32
    scf.if %13 {
      %c0_10 = arith.constant 0 : index
      %c0_11 = arith.constant 0 : index
      %14 = vector.load %arg9[%c0_10, %c0_11] : memref<16x32xf32, #tpu.memory_space<vmem>>, vector<16x32xf32>
      %c0_12 = arith.constant 0 : index
      %c0_13 = arith.constant 0 : index
      %15 = vector.load %arg4[%c0_12, %c0_13] : memref<1x32xf32, #tpu.memory_space<vmem>>, vector<1x32xf32>
      %16 = vector.broadcast %15 : vector<1x32xf32> to vector<16x32xf32>
      %17 = arith.addf %14, %16 : vector<16x32xf32>
      %c0_14 = arith.constant 0 : index
      %c0_15 = arith.constant 0 : index
      %18 = vector.load %arg5[%c0_14, %c0_15] : memref<16x32xf32, #tpu.memory_space<vmem>>, vector<16x32xf32>
      %19 = arith.addf %17, %18 : vector<16x32xf32>
      %cst_16 = arith.constant dense<0.000000e+00> : vector<16xf32>
      %20 = vector.multi_reduction <add>, %19, %cst_16 [1] : vector<16x32xf32> to vector<16xf32>
      %21 = vector.shape_cast %20 : vector<16xf32> to vector<16x1xf32>
      %cst_17 = arith.constant 3.200000e+01 : f32
      %22 = vector.broadcast %cst_17 : f32 to vector<16x1xf32>
      %23 = arith.divf %21, %22 : vector<16x1xf32>
      %24 = vector.broadcast %23 : vector<16x1xf32> to vector<16x32xf32>
      %25 = arith.subf %19, %24 : vector<16x32xf32>
      %26 = arith.mulf %25, %25 : vector<16x32xf32>
      %cst_18 = arith.constant dense<0.000000e+00> : vector<16xf32>
      %27 = vector.multi_reduction <add>, %26, %cst_18 [1] : vector<16x32xf32> to vector<16xf32>
      %28 = vector.shape_cast %27 : vector<16xf32> to vector<16x1xf32>
      %cst_19 = arith.constant 3.200000e+01 : f32
      %29 = vector.broadcast %cst_19 : f32 to vector<16x1xf32>
      %30 = arith.divf %28, %29 : vector<16x1xf32>
      %31 = vector.broadcast %23 : vector<16x1xf32> to vector<16x32xf32>
      %32 = arith.subf %19, %31 : vector<16x32xf32>
      %cst_20 = arith.constant 9.99999974E-6 : f32
      %33 = vector.broadcast %cst_20 : f32 to vector<16x1xf32>
      %34 = arith.addf %30, %33 : vector<16x1xf32>
      %35 = math.rsqrt %34 : vector<16x1xf32>
      %36 = vector.broadcast %35 : vector<16x1xf32> to vector<16x32xf32>
      %37 = arith.mulf %32, %36 : vector<16x32xf32>
      %c0_21 = arith.constant 0 : index
      %c0_22 = arith.constant 0 : index
      %38 = vector.load %arg6[%c0_21, %c0_22] : memref<1x32xf32, #tpu.memory_space<vmem>>, vector<1x32xf32>
      %39 = vector.broadcast %38 : vector<1x32xf32> to vector<16x32xf32>
      %40 = arith.mulf %37, %39 : vector<16x32xf32>
      %c0_23 = arith.constant 0 : index
      %c0_24 = arith.constant 0 : index
      %41 = vector.load %arg7[%c0_23, %c0_24] : memref<1x32xf32, #tpu.memory_space<vmem>>, vector<1x32xf32>
      %42 = vector.broadcast %41 : vector<1x32xf32> to vector<16x32xf32>
      %43 = arith.addf %40, %42 : vector<16x32xf32>
      %c0_25 = arith.constant 0 : index
      %c0_26 = arith.constant 0 : index
      %44 = vector.load %arg8[%c0_25, %c0_26] : memref<16x32xf32, #tpu.memory_space<vmem>>, vector<16x32xf32>
      tpu.vector_store %arg8[%c0_25, %c0_26], %43 {strides = array<i32>} : memref<16x32xf32, #tpu.memory_space<vmem>>, vector<16x32xf32>,
    } else {
    }
    return
  }
  func.func @transform_0(%arg0: i32, %arg1: i32) -> (i32, i32) {
    %c0_i32 = arith.constant 0 : i32
    return %arg0, %arg1 : i32, i32
  }
  func.func @transform_1(%arg0: i32, %arg1: i32) -> (i32, i32) {
    %c0_i32 = arith.constant 0 : i32
    %c0_i32_0 = arith.constant 0 : i32
    return %arg1, %c0_i32 : i32, i32
  }
  func.func @transform_2(%arg0: i32, %arg1: i32) -> (i32, i32) {
    %c0_i32 = arith.constant 0 : i32
    %c0_i32_0 = arith.constant 0 : i32
    %c0_i32_1 = arith.constant 0 : i32
    return %c0_i32, %c0_i32_0 : i32, i32
  }
  func.func @transform_3(%arg0: i32, %arg1: i32) -> (i32, i32) {
    %c0_i32 = arith.constant 0 : i32
    %c0_i32_0 = arith.constant 0 : i32
    return %arg0, %c0_i32 : i32, i32
  }
  func.func @transform_4(%arg0: i32, %arg1: i32) -> (i32, i32) {
    %c0_i32 = arith.constant 0 : i32
    %c0_i32_0 = arith.constant 0 : i32
    %c0_i32_1 = arith.constant 0 : i32
    return %c0_i32, %c0_i32_0 : i32, i32
  }
  func.func @transform_5(%arg0: i32, %arg1: i32) -> (i32, i32) {
    %c0_i32 = arith.constant 0 : i32
    %c0_i32_0 = arith.constant 0 : i32
    %c0_i32_1 = arith.constant 0 : i32
    return %c0_i32, %c0_i32_0 : i32, i32
  }
  func.func @transform_6(%arg0: i32, %arg1: i32) -> (i32, i32) {
    %c0_i32 = arith.constant 0 : i32
    %c0_i32_0 = arith.constant 0 : i32
    return %arg0, %c0_i32 : i32, i32
  }
}

module attributes {stable_mosaic.version = 11 : i64} {
  func.func @_mha_kernel(%arg0: i32, %arg1: memref<1x8x32xf32, #tpu.memory_space<vmem>>, %arg2: memref<1x8x32xf32, #tpu.memory_space<vmem>>, %arg3: memref<1x8x32xf32, #tpu.memory_space<vmem>>, %arg4: memref<1x8x32xf32, #tpu.memory_space<vmem>>) attributes {dimension_semantics = [#tpu.dimension_semantics<parallel>], iteration_bounds = array<i64: 2>, scalar_prefetch = 0 : i64, scratch_operands = 0 : i64, tpu.core_type = #tpu.core_type<tc>, window_params = [{transform_indices = @transform_0, window_bounds = array<i64: 1, 8, 32>}, {transform_indices = @transform_1, window_bounds = array<i64: 1, 8, 32>}, {transform_indices = @transform_2, window_bounds = array<i64: 1, 8, 32>}, {transform_indices = @transform_3, window_bounds = array<i64: 1, 8, 32>}]} {
    %0 = tpu.iota {dimensions = array<i32: 0>} : vector<8x8xi32>
    %1 = tpu.iota {dimensions = array<i32: 1>} : vector<8x8xi32>
    %2 = arith.cmpi sle, %1, %0 : vector<8x8xi32>
    %cst = arith.constant 0.000000e+00 : f32
    %cst_0 = arith.constant -1.000000e+30 : f32
    %3 = vector.broadcast %cst : f32 to vector<8x8xf32>
    %4 = vector.broadcast %cst_0 : f32 to vector<8x8xf32>
    %5 = arith.select %2, %3, %4 : vector<8x8xi1>, vector<8x8xf32>
    %c0 = arith.constant 0 : index
    %c0_1 = arith.constant 0 : index
    %c0_2 = arith.constant 0 : index
    %6 = vector.load %arg1[%c0, %c0_1, %c0_2] : memref<1x8x32xf32, #tpu.memory_space<vmem>>, vector<1x8x8xf32>
    %7 = vector.shape_cast %6 : vector<1x8x8xf32> to vector<8x8xf32>
    %8 = arith.truncf %7 : vector<8x8xf32> to vector<8x8xbf16>
    %c0_3 = arith.constant 0 : index
    %c0_4 = arith.constant 0 : index
    %c0_5 = arith.constant 0 : index
    %9 = vector.load %arg2[%c0_3, %c0_4, %c0_5] : memref<1x8x32xf32, #tpu.memory_space<vmem>>, vector<1x8x8xf32>
    %10 = vector.shape_cast %9 : vector<1x8x8xf32> to vector<8x8xf32>
    %11 = arith.truncf %10 : vector<8x8xf32> to vector<8x8xbf16>
    %c0_6 = arith.constant 0 : index
    %c0_7 = arith.constant 0 : index
    %c0_8 = arith.constant 0 : index
    %12 = vector.load %arg3[%c0_6, %c0_7, %c0_8] : memref<1x8x32xf32, #tpu.memory_space<vmem>>, vector<1x8x8xf32>
    %13 = vector.shape_cast %12 : vector<1x8x8xf32> to vector<8x8xf32>
    %14 = arith.truncf %13 : vector<8x8xf32> to vector<8x8xbf16>
    %cst_9 = arith.constant dense<0.000000e+00> : vector<8x8xf32>
    %15 = tpu.matmul %8, %11, %cst_9 {dimension_numbers = #tpu.dot_dimension_numbers<[1], [1], [0], [0], [0, 0, 1, 0], [], []>} : vector<8x8xbf16>, vector<8x8xbf16>, vector<8x8xf32> -> vector<8x8xf32>
    %cst_10 = arith.constant 0.353553385 : f32
    %16 = vector.broadcast %cst_10 : f32 to vector<8x8xf32>
    %17 = arith.mulf %15, %16 : vector<8x8xf32>
    %18 = arith.addf %17, %5 : vector<8x8xf32>
    %cst_11 = arith.constant dense<0xFF800000> : vector<8xf32>
    %19 = vector.multi_reduction <maximumf>, %18, %cst_11 [1] : vector<8x8xf32> to vector<8xf32>
    %20 = vector.shape_cast %19 : vector<8xf32> to vector<8x1xf32>
    %21 = vector.broadcast %20 : vector<8x1xf32> to vector<8x8xf32>
    %22 = arith.subf %18, %21 : vector<8x8xf32>
    %23 = math.exp %22 : vector<8x8xf32>
    %cst_12 = arith.constant dense<0.000000e+00> : vector<8xf32>
    %24 = vector.multi_reduction <add>, %23, %cst_12 [1] : vector<8x8xf32> to vector<8xf32>
    %25 = vector.shape_cast %24 : vector<8xf32> to vector<8x1xf32>
    %26 = tpu.reciprocal %25 {approx = true} : vector<8x1xf32> -> vector<8x1xf32>
    %27 = vector.broadcast %26 : vector<8x1xf32> to vector<8x8xf32>
    %28 = arith.mulf %23, %27 : vector<8x8xf32>
    %29 = arith.truncf %28 : vector<8x8xf32> to vector<8x8xbf16>
    %cst_13 = arith.constant dense<0.000000e+00> : vector<8x8xf32>
    %30 = tpu.matmul %29, %14, %cst_13 {dimension_numbers = #tpu.dot_dimension_numbers<[1], [0], [0], [1], [0, 0, 1, 1], [], []>} : vector<8x8xbf16>, vector<8x8xbf16>, vector<8x8xf32> -> vector<8x8xf32>
    %c0_14 = arith.constant 0 : index
    %c0_15 = arith.constant 0 : index
    %c0_16 = arith.constant 0 : index
    %31 = vector.load %arg4[%c0_14, %c0_15, %c0_16] : memref<1x8x32xf32, #tpu.memory_space<vmem>>, vector<1x8x8xf32>
    %32 = vector.shape_cast %31 : vector<1x8x8xf32> to vector<8x8xf32>
    %33 = vector.shape_cast %30 : vector<8x8xf32> to vector<1x8x8xf32>
    tpu.vector_store %arg4[%c0_14, %c0_15, %c0_16], %33 {strides = array<i32>} : memref<1x8x32xf32, #tpu.memory_space<vmem>>, vector<1x8x8xf32>,
    %c0_17 = arith.constant 0 : index
    %c0_18 = arith.constant 0 : index
    %c8 = arith.constant 8 : index
    %34 = vector.load %arg1[%c0_17, %c0_18, %c8] : memref<1x8x32xf32, #tpu.memory_space<vmem>>, vector<1x8x8xf32>
    %35 = vector.shape_cast %34 : vector<1x8x8xf32> to vector<8x8xf32>
    %36 = arith.truncf %35 : vector<8x8xf32> to vector<8x8xbf16>
    %c0_19 = arith.constant 0 : index
    %c0_20 = arith.constant 0 : index
    %c8_21 = arith.constant 8 : index
    %37 = vector.load %arg2[%c0_19, %c0_20, %c8_21] : memref<1x8x32xf32, #tpu.memory_space<vmem>>, vector<1x8x8xf32>
    %38 = vector.shape_cast %37 : vector<1x8x8xf32> to vector<8x8xf32>
    %39 = arith.truncf %38 : vector<8x8xf32> to vector<8x8xbf16>
    %c0_22 = arith.constant 0 : index
    %c0_23 = arith.constant 0 : index
    %c8_24 = arith.constant 8 : index
    %40 = vector.load %arg3[%c0_22, %c0_23, %c8_24] : memref<1x8x32xf32, #tpu.memory_space<vmem>>, vector<1x8x8xf32>
    %41 = vector.shape_cast %40 : vector<1x8x8xf32> to vector<8x8xf32>
    %42 = arith.truncf %41 : vector<8x8xf32> to vector<8x8xbf16>
    %cst_25 = arith.constant dense<0.000000e+00> : vector<8x8xf32>
    %43 = tpu.matmul %36, %39, %cst_25 {dimension_numbers = #tpu.dot_dimension_numbers<[1], [1], [0], [0], [0, 0, 1, 0], [], []>} : vector<8x8xbf16>, vector<8x8xbf16>, vector<8x8xf32> -> vector<8x8xf32>
    %cst_26 = arith.constant 0.353553385 : f32
    %44 = vector.broadcast %cst_26 : f32 to vector<8x8xf32>
    %45 = arith.mulf %43, %44 : vector<8x8xf32>
    %46 = arith.addf %45, %5 : vector<8x8xf32>
    %cst_27 = arith.constant dense<0xFF800000> : vector<8xf32>
    %47 = vector.multi_reduction <maximumf>, %46, %cst_27 [1] : vector<8x8xf32> to vector<8xf32>
    %48 = vector.shape_cast %47 : vector<8xf32> to vector<8x1xf32>
    %49 = vector.broadcast %48 : vector<8x1xf32> to vector<8x8xf32>
    %50 = arith.subf %46, %49 : vector<8x8xf32>
    %51 = math.exp %50 : vector<8x8xf32>
    %cst_28 = arith.constant dense<0.000000e+00> : vector<8xf32>
    %52 = vector.multi_reduction <add>, %51, %cst_28 [1] : vector<8x8xf32> to vector<8xf32>
    %53 = vector.shape_cast %52 : vector<8xf32> to vector<8x1xf32>
    %54 = tpu.reciprocal %53 {approx = true} : vector<8x1xf32> -> vector<8x1xf32>
    %55 = vector.broadcast %54 : vector<8x1xf32> to vector<8x8xf32>
    %56 = arith.mulf %51, %55 : vector<8x8xf32>
    %57 = arith.truncf %56 : vector<8x8xf32> to vector<8x8xbf16>
    %cst_29 = arith.constant dense<0.000000e+00> : vector<8x8xf32>
    %58 = tpu.matmul %57, %42, %cst_29 {dimension_numbers = #tpu.dot_dimension_numbers<[1], [0], [0], [1], [0, 0, 1, 1], [], []>} : vector<8x8xbf16>, vector<8x8xbf16>, vector<8x8xf32> -> vector<8x8xf32>
    %c0_30 = arith.constant 0 : index
    %c0_31 = arith.constant 0 : index
    %c8_32 = arith.constant 8 : index
    %59 = vector.load %arg4[%c0_30, %c0_31, %c8_32] : memref<1x8x32xf32, #tpu.memory_space<vmem>>, vector<1x8x8xf32>
    %60 = vector.shape_cast %59 : vector<1x8x8xf32> to vector<8x8xf32>
    %61 = vector.shape_cast %58 : vector<8x8xf32> to vector<1x8x8xf32>
    tpu.vector_store %arg4[%c0_30, %c0_31, %c8_32], %61 {strides = array<i32>} : memref<1x8x32xf32, #tpu.memory_space<vmem>>, vector<1x8x8xf32>,
    %c0_33 = arith.constant 0 : index
    %c0_34 = arith.constant 0 : index
    %c16 = arith.constant 16 : index
    %62 = vector.load %arg1[%c0_33, %c0_34, %c16] : memref<1x8x32xf32, #tpu.memory_space<vmem>>, vector<1x8x8xf32>
    %63 = vector.shape_cast %62 : vector<1x8x8xf32> to vector<8x8xf32>
    %64 = arith.truncf %63 : vector<8x8xf32> to vector<8x8xbf16>
    %c0_35 = arith.constant 0 : index
    %c0_36 = arith.constant 0 : index
    %c16_37 = arith.constant 16 : index
    %65 = vector.load %arg2[%c0_35, %c0_36, %c16_37] : memref<1x8x32xf32, #tpu.memory_space<vmem>>, vector<1x8x8xf32>
    %66 = vector.shape_cast %65 : vector<1x8x8xf32> to vector<8x8xf32>
    %67 = arith.truncf %66 : vector<8x8xf32> to vector<8x8xbf16>
    %c0_38 = arith.constant 0 : index
    %c0_39 = arith.constant 0 : index
    %c16_40 = arith.constant 16 : index
    %68 = vector.load %arg3[%c0_38, %c0_39, %c16_40] : memref<1x8x32xf32, #tpu.memory_space<vmem>>, vector<1x8x8xf32>
    %69 = vector.shape_cast %68 : vector<1x8x8xf32> to vector<8x8xf32>
    %70 = arith.truncf %69 : vector<8x8xf32> to vector<8x8xbf16>
    %cst_41 = arith.constant dense<0.000000e+00> : vector<8x8xf32>
    %71 = tpu.matmul %64, %67, %cst_41 {dimension_numbers = #tpu.dot_dimension_numbers<[1], [1], [0], [0], [0, 0, 1, 0], [], []>} : vector<8x8xbf16>, vector<8x8xbf16>, vector<8x8xf32> -> vector<8x8xf32>
    %cst_42 = arith.constant 0.353553385 : f32
    %72 = vector.broadcast %cst_42 : f32 to vector<8x8xf32>
    %73 = arith.mulf %71, %72 : vector<8x8xf32>
    %74 = arith.addf %73, %5 : vector<8x8xf32>
    %cst_43 = arith.constant dense<0xFF800000> : vector<8xf32>
    %75 = vector.multi_reduction <maximumf>, %74, %cst_43 [1] : vector<8x8xf32> to vector<8xf32>
    %76 = vector.shape_cast %75 : vector<8xf32> to vector<8x1xf32>
    %77 = vector.broadcast %76 : vector<8x1xf32> to vector<8x8xf32>
    %78 = arith.subf %74, %77 : vector<8x8xf32>
    %79 = math.exp %78 : vector<8x8xf32>
    %cst_44 = arith.constant dense<0.000000e+00> : vector<8xf32>
    %80 = vector.multi_reduction <add>, %79, %cst_44 [1] : vector<8x8xf32> to vector<8xf32>
    %81 = vector.shape_cast %80 : vector<8xf32> to vector<8x1xf32>
    %82 = tpu.reciprocal %81 {approx = true} : vector<8x1xf32> -> vector<8x1xf32>
    %83 = vector.broadcast %82 : vector<8x1xf32> to vector<8x8xf32>
    %84 = arith.mulf %79, %83 : vector<8x8xf32>
    %85 = arith.truncf %84 : vector<8x8xf32> to vector<8x8xbf16>
    %cst_45 = arith.constant dense<0.000000e+00> : vector<8x8xf32>
    %86 = tpu.matmul %85, %70, %cst_45 {dimension_numbers = #tpu.dot_dimension_numbers<[1], [0], [0], [1], [0, 0, 1, 1], [], []>} : vector<8x8xbf16>, vector<8x8xbf16>, vector<8x8xf32> -> vector<8x8xf32>
    %c0_46 = arith.constant 0 : index
    %c0_47 = arith.constant 0 : index
    %c16_48 = arith.constant 16 : index
    %87 = vector.load %arg4[%c0_46, %c0_47, %c16_48] : memref<1x8x32xf32, #tpu.memory_space<vmem>>, vector<1x8x8xf32>
    %88 = vector.shape_cast %87 : vector<1x8x8xf32> to vector<8x8xf32>
    %89 = vector.shape_cast %86 : vector<8x8xf32> to vector<1x8x8xf32>
    tpu.vector_store %arg4[%c0_46, %c0_47, %c16_48], %89 {strides = array<i32>} : memref<1x8x32xf32, #tpu.memory_space<vmem>>, vector<1x8x8xf32>,
    %c0_49 = arith.constant 0 : index
    %c0_50 = arith.constant 0 : index
    %c24 = arith.constant 24 : index
    %90 = vector.load %arg1[%c0_49, %c0_50, %c24] : memref<1x8x32xf32, #tpu.memory_space<vmem>>, vector<1x8x8xf32>
    %91 = vector.shape_cast %90 : vector<1x8x8xf32> to vector<8x8xf32>
    %92 = arith.truncf %91 : vector<8x8xf32> to vector<8x8xbf16>
    %c0_51 = arith.constant 0 : index
    %c0_52 = arith.constant 0 : index
    %c24_53 = arith.constant 24 : index
    %93 = vector.load %arg2[%c0_51, %c0_52, %c24_53] : memref<1x8x32xf32, #tpu.memory_space<vmem>>, vector<1x8x8xf32>
    %94 = vector.shape_cast %93 : vector<1x8x8xf32> to vector<8x8xf32>
    %95 = arith.truncf %94 : vector<8x8xf32> to vector<8x8xbf16>
    %c0_54 = arith.constant 0 : index
    %c0_55 = arith.constant 0 : index
    %c24_56 = arith.constant 24 : index
    %96 = vector.load %arg3[%c0_54, %c0_55, %c24_56] : memref<1x8x32xf32, #tpu.memory_space<vmem>>, vector<1x8x8xf32>
    %97 = vector.shape_cast %96 : vector<1x8x8xf32> to vector<8x8xf32>
    %98 = arith.truncf %97 : vector<8x8xf32> to vector<8x8xbf16>
    %cst_57 = arith.constant dense<0.000000e+00> : vector<8x8xf32>
    %99 = tpu.matmul %92, %95, %cst_57 {dimension_numbers = #tpu.dot_dimension_numbers<[1], [1], [0], [0], [0, 0, 1, 0], [], []>} : vector<8x8xbf16>, vector<8x8xbf16>, vector<8x8xf32> -> vector<8x8xf32>
    %cst_58 = arith.constant 0.353553385 : f32
    %100 = vector.broadcast %cst_58 : f32 to vector<8x8xf32>
    %101 = arith.mulf %99, %100 : vector<8x8xf32>
    %102 = arith.addf %101, %5 : vector<8x8xf32>
    %cst_59 = arith.constant dense<0xFF800000> : vector<8xf32>
    %103 = vector.multi_reduction <maximumf>, %102, %cst_59 [1] : vector<8x8xf32> to vector<8xf32>
    %104 = vector.shape_cast %103 : vector<8xf32> to vector<8x1xf32>
    %105 = vector.broadcast %104 : vector<8x1xf32> to vector<8x8xf32>
    %106 = arith.subf %102, %105 : vector<8x8xf32>
    %107 = math.exp %106 : vector<8x8xf32>
    %cst_60 = arith.constant dense<0.000000e+00> : vector<8xf32>
    %108 = vector.multi_reduction <add>, %107, %cst_60 [1] : vector<8x8xf32> to vector<8xf32>
    %109 = vector.shape_cast %108 : vector<8xf32> to vector<8x1xf32>
    %110 = tpu.reciprocal %109 {approx = true} : vector<8x1xf32> -> vector<8x1xf32>
    %111 = vector.broadcast %110 : vector<8x1xf32> to vector<8x8xf32>
    %112 = arith.mulf %107, %111 : vector<8x8xf32>
    %113 = arith.truncf %112 : vector<8x8xf32> to vector<8x8xbf16>
    %cst_61 = arith.constant dense<0.000000e+00> : vector<8x8xf32>
    %114 = tpu.matmul %113, %98, %cst_61 {dimension_numbers = #tpu.dot_dimension_numbers<[1], [0], [0], [1], [0, 0, 1, 1], [], []>} : vector<8x8xbf16>, vector<8x8xbf16>, vector<8x8xf32> -> vector<8x8xf32>
    %c0_62 = arith.constant 0 : index
    %c0_63 = arith.constant 0 : index
    %c24_64 = arith.constant 24 : index
    %115 = vector.load %arg4[%c0_62, %c0_63, %c24_64] : memref<1x8x32xf32, #tpu.memory_space<vmem>>, vector<1x8x8xf32>
    %116 = vector.shape_cast %115 : vector<1x8x8xf32> to vector<8x8xf32>
    %117 = vector.shape_cast %114 : vector<8x8xf32> to vector<1x8x8xf32>
    tpu.vector_store %arg4[%c0_62, %c0_63, %c24_64], %117 {strides = array<i32>} : memref<1x8x32xf32, #tpu.memory_space<vmem>>, vector<1x8x8xf32>,
    return
  }
  func.func @transform_0(%arg0: i32) -> (i32, i32, i32) {
    %c0_i32 = arith.constant 0 : i32
    %c0_i32_0 = arith.constant 0 : i32
    %c0_i32_1 = arith.constant 0 : i32
    return %arg0, %c0_i32, %c0_i32_0 : i32, i32, i32
  }
  func.func @transform_1(%arg0: i32) -> (i32, i32, i32) {
    %c0_i32 = arith.constant 0 : i32
    %c0_i32_0 = arith.constant 0 : i32
    %c0_i32_1 = arith.constant 0 : i32
    return %arg0, %c0_i32, %c0_i32_0 : i32, i32, i32
  }
  func.func @transform_2(%arg0: i32) -> (i32, i32, i32) {
    %c0_i32 = arith.constant 0 : i32
    %c0_i32_0 = arith.constant 0 : i32
    %c0_i32_1 = arith.constant 0 : i32
    return %arg0, %c0_i32, %c0_i32_0 : i32, i32, i32
  }
  func.func @transform_3(%arg0: i32) -> (i32, i32, i32) {
    %c0_i32 = arith.constant 0 : i32
    %c0_i32_0 = arith.constant 0 : i32
    %c0_i32_1 = arith.constant 0 : i32
    return %arg0, %c0_i32, %c0_i32_0 : i32, i32, i32
  }
}

module attributes {stable_mosaic.version = 11 : i64} {
  func.func @_mha_kernel(%arg0: i32, %arg1: memref<1x8x32xf32, #tpu.memory_space<vmem>>, %arg2: memref<1x8x32xf32, #tpu.memory_space<vmem>>, %arg3: memref<1x8x32xf32, #tpu.memory_space<vmem>>, %arg4: memref<1x8x32xf32, #tpu.memory_space<vmem>>) attributes {dimension_semantics = [#tpu.dimension_semantics<parallel>], iteration_bounds = array<i64: 2>, scalar_prefetch = 0 : i64, scratch_operands = 0 : i64, tpu.core_type = #tpu.core_type<tc>, window_params = [{transform_indices = @transform_0, window_bounds = array<i64: 1, 8, 32>}, {transform_indices = @transform_1, window_bounds = array<i64: 1, 8, 32>}, {transform_indices = @transform_2, window_bounds = array<i64: 1, 8, 32>}, {transform_indices = @transform_3, window_bounds = array<i64: 1, 8, 32>}]} {
    %c0 = arith.constant 0 : index
    %c0_0 = arith.constant 0 : index
    %c0_1 = arith.constant 0 : index
    %0 = vector.load %arg1[%c0, %c0_0, %c0_1] : memref<1x8x32xf32, #tpu.memory_space<vmem>>, vector<1x8x8xf32>
    %1 = vector.shape_cast %0 : vector<1x8x8xf32> to vector<8x8xf32>
    %2 = arith.truncf %1 : vector<8x8xf32> to vector<8x8xbf16>
    %c0_2 = arith.constant 0 : index
    %c0_3 = arith.constant 0 : index
    %c0_4 = arith.constant 0 : index
    %3 = vector.load %arg2[%c0_2, %c0_3, %c0_4] : memref<1x8x32xf32, #tpu.memory_space<vmem>>, vector<1x8x8xf32>
    %4 = vector.shape_cast %3 : vector<1x8x8xf32> to vector<8x8xf32>
    %5 = arith.truncf %4 : vector<8x8xf32> to vector<8x8xbf16>
    %c0_5 = arith.constant 0 : index
    %c0_6 = arith.constant 0 : index
    %c0_7 = arith.constant 0 : index
    %6 = vector.load %arg3[%c0_5, %c0_6, %c0_7] : memref<1x8x32xf32, #tpu.memory_space<vmem>>, vector<1x8x8xf32>
    %7 = vector.shape_cast %6 : vector<1x8x8xf32> to vector<8x8xf32>
    %8 = arith.truncf %7 : vector<8x8xf32> to vector<8x8xbf16>
    %cst = arith.constant dense<0.000000e+00> : vector<8x8xf32>
    %9 = tpu.matmul %2, %5, %cst {dimension_numbers = #tpu.dot_dimension_numbers<[1], [1], [0], [0], [0, 0, 1, 0], [], []>} : vector<8x8xbf16>, vector<8x8xbf16>, vector<8x8xf32> -> vector<8x8xf32>
    %cst_8 = arith.constant 0.353553385 : f32
    %10 = vector.broadcast %cst_8 : f32 to vector<8x8xf32>
    %11 = arith.mulf %9, %10 : vector<8x8xf32>
    %cst_9 = arith.constant dense<0xFF800000> : vector<8xf32>
    %12 = vector.multi_reduction <maximumf>, %11, %cst_9 [1] : vector<8x8xf32> to vector<8xf32>
    %13 = vector.shape_cast %12 : vector<8xf32> to vector<8x1xf32>
    %14 = vector.broadcast %13 : vector<8x1xf32> to vector<8x8xf32>
    %15 = arith.subf %11, %14 : vector<8x8xf32>
    %16 = math.exp %15 : vector<8x8xf32>
    %cst_10 = arith.constant dense<0.000000e+00> : vector<8xf32>
    %17 = vector.multi_reduction <add>, %16, %cst_10 [1] : vector<8x8xf32> to vector<8xf32>
    %18 = vector.shape_cast %17 : vector<8xf32> to vector<8x1xf32>
    %19 = tpu.reciprocal %18 {approx = true} : vector<8x1xf32> -> vector<8x1xf32>
    %20 = vector.broadcast %19 : vector<8x1xf32> to vector<8x8xf32>
    %21 = arith.mulf %16, %20 : vector<8x8xf32>
    %22 = arith.truncf %21 : vector<8x8xf32> to vector<8x8xbf16>
    %cst_11 = arith.constant dense<0.000000e+00> : vector<8x8xf32>
    %23 = tpu.matmul %22, %8, %cst_11 {dimension_numbers = #tpu.dot_dimension_numbers<[1], [0], [0], [1], [0, 0, 1, 1], [], []>} : vector<8x8xbf16>, vector<8x8xbf16>, vector<8x8xf32> -> vector<8x8xf32>
    %c0_12 = arith.constant 0 : index
    %c0_13 = arith.constant 0 : index
    %c0_14 = arith.constant 0 : index
    %24 = vector.load %arg4[%c0_12, %c0_13, %c0_14] : memref<1x8x32xf32, #tpu.memory_space<vmem>>, vector<1x8x8xf32>
    %25 = vector.shape_cast %24 : vector<1x8x8xf32> to vector<8x8xf32>
    %26 = vector.shape_cast %23 : vector<8x8xf32> to vector<1x8x8xf32>
    tpu.vector_store %arg4[%c0_12, %c0_13, %c0_14], %26 {strides = array<i32>} : memref<1x8x32xf32, #tpu.memory_space<vmem>>, vector<1x8x8xf32>,
    %c0_15 = arith.constant 0 : index
    %c0_16 = arith.constant 0 : index
    %c8 = arith.constant 8 : index
    %27 = vector.load %arg1[%c0_15, %c0_16, %c8] : memref<1x8x32xf32, #tpu.memory_space<vmem>>, vector<1x8x8xf32>
    %28 = vector.shape_cast %27 : vector<1x8x8xf32> to vector<8x8xf32>
    %29 = arith.truncf %28 : vector<8x8xf32> to vector<8x8xbf16>
    %c0_17 = arith.constant 0 : index
    %c0_18 = arith.constant 0 : index
    %c8_19 = arith.constant 8 : index
    %30 = vector.load %arg2[%c0_17, %c0_18, %c8_19] : memref<1x8x32xf32, #tpu.memory_space<vmem>>, vector<1x8x8xf32>
    %31 = vector.shape_cast %30 : vector<1x8x8xf32> to vector<8x8xf32>
    %32 = arith.truncf %31 : vector<8x8xf32> to vector<8x8xbf16>
    %c0_20 = arith.constant 0 : index
    %c0_21 = arith.constant 0 : index
    %c8_22 = arith.constant 8 : index
    %33 = vector.load %arg3[%c0_20, %c0_21, %c8_22] : memref<1x8x32xf32, #tpu.memory_space<vmem>>, vector<1x8x8xf32>
    %34 = vector.shape_cast %33 : vector<1x8x8xf32> to vector<8x8xf32>
    %35 = arith.truncf %34 : vector<8x8xf32> to vector<8x8xbf16>
    %cst_23 = arith.constant dense<0.000000e+00> : vector<8x8xf32>
    %36 = tpu.matmul %29, %32, %cst_23 {dimension_numbers = #tpu.dot_dimension_numbers<[1], [1], [0], [0], [0, 0, 1, 0], [], []>} : vector<8x8xbf16>, vector<8x8xbf16>, vector<8x8xf32> -> vector<8x8xf32>
    %cst_24 = arith.constant 0.353553385 : f32
    %37 = vector.broadcast %cst_24 : f32 to vector<8x8xf32>
    %38 = arith.mulf %36, %37 : vector<8x8xf32>
    %cst_25 = arith.constant dense<0xFF800000> : vector<8xf32>
    %39 = vector.multi_reduction <maximumf>, %38, %cst_25 [1] : vector<8x8xf32> to vector<8xf32>
    %40 = vector.shape_cast %39 : vector<8xf32> to vector<8x1xf32>
    %41 = vector.broadcast %40 : vector<8x1xf32> to vector<8x8xf32>
    %42 = arith.subf %38, %41 : vector<8x8xf32>
    %43 = math.exp %42 : vector<8x8xf32>
    %cst_26 = arith.constant dense<0.000000e+00> : vector<8xf32>
    %44 = vector.multi_reduction <add>, %43, %cst_26 [1] : vector<8x8xf32> to vector<8xf32>
    %45 = vector.shape_cast %44 : vector<8xf32> to vector<8x1xf32>
    %46 = tpu.reciprocal %45 {approx = true} : vector<8x1xf32> -> vector<8x1xf32>
    %47 = vector.broadcast %46 : vector<8x1xf32> to vector<8x8xf32>
    %48 = arith.mulf %43, %47 : vector<8x8xf32>
    %49 = arith.truncf %48 : vector<8x8xf32> to vector<8x8xbf16>
    %cst_27 = arith.constant dense<0.000000e+00> : vector<8x8xf32>
    %50 = tpu.matmul %49, %35, %cst_27 {dimension_numbers = #tpu.dot_dimension_numbers<[1], [0], [0], [1], [0, 0, 1, 1], [], []>} : vector<8x8xbf16>, vector<8x8xbf16>, vector<8x8xf32> -> vector<8x8xf32>
    %c0_28 = arith.constant 0 : index
    %c0_29 = arith.constant 0 : index
    %c8_30 = arith.constant 8 : index
    %51 = vector.load %arg4[%c0_28, %c0_29, %c8_30] : memref<1x8x32xf32, #tpu.memory_space<vmem>>, vector<1x8x8xf32>
    %52 = vector.shape_cast %51 : vector<1x8x8xf32> to vector<8x8xf32>
    %53 = vector.shape_cast %50 : vector<8x8xf32> to vector<1x8x8xf32>
    tpu.vector_store %arg4[%c0_28, %c0_29, %c8_30], %53 {strides = array<i32>} : memref<1x8x32xf32, #tpu.memory_space<vmem>>, vector<1x8x8xf32>,
    %c0_31 = arith.constant 0 : index
    %c0_32 = arith.constant 0 : index
    %c16 = arith.constant 16 : index
    %54 = vector.load %arg1[%c0_31, %c0_32, %c16] : memref<1x8x32xf32, #tpu.memory_space<vmem>>, vector<1x8x8xf32>
    %55 = vector.shape_cast %54 : vector<1x8x8xf32> to vector<8x8xf32>
    %56 = arith.truncf %55 : vector<8x8xf32> to vector<8x8xbf16>
    %c0_33 = arith.constant 0 : index
    %c0_34 = arith.constant 0 : index
    %c16_35 = arith.constant 16 : index
    %57 = vector.load %arg2[%c0_33, %c0_34, %c16_35] : memref<1x8x32xf32, #tpu.memory_space<vmem>>, vector<1x8x8xf32>
    %58 = vector.shape_cast %57 : vector<1x8x8xf32> to vector<8x8xf32>
    %59 = arith.truncf %58 : vector<8x8xf32> to vector<8x8xbf16>
    %c0_36 = arith.constant 0 : index
    %c0_37 = arith.constant 0 : index
    %c16_38 = arith.constant 16 : index
    %60 = vector.load %arg3[%c0_36, %c0_37, %c16_38] : memref<1x8x32xf32, #tpu.memory_space<vmem>>, vector<1x8x8xf32>
    %61 = vector.shape_cast %60 : vector<1x8x8xf32> to vector<8x8xf32>
    %62 = arith.truncf %61 : vector<8x8xf32> to vector<8x8xbf16>
    %cst_39 = arith.constant dense<0.000000e+00> : vector<8x8xf32>
    %63 = tpu.matmul %56, %59, %cst_39 {dimension_numbers = #tpu.dot_dimension_numbers<[1], [1], [0], [0], [0, 0, 1, 0], [], []>} : vector<8x8xbf16>, vector<8x8xbf16>, vector<8x8xf32> -> vector<8x8xf32>
    %cst_40 = arith.constant 0.353553385 : f32
    %64 = vector.broadcast %cst_40 : f32 to vector<8x8xf32>
    %65 = arith.mulf %63, %64 : vector<8x8xf32>
    %cst_41 = arith.constant dense<0xFF800000> : vector<8xf32>
    %66 = vector.multi_reduction <maximumf>, %65, %cst_41 [1] : vector<8x8xf32> to vector<8xf32>
    %67 = vector.shape_cast %66 : vector<8xf32> to vector<8x1xf32>
    %68 = vector.broadcast %67 : vector<8x1xf32> to vector<8x8xf32>
    %69 = arith.subf %65, %68 : vector<8x8xf32>
    %70 = math.exp %69 : vector<8x8xf32>
    %cst_42 = arith.constant dense<0.000000e+00> : vector<8xf32>
    %71 = vector.multi_reduction <add>, %70, %cst_42 [1] : vector<8x8xf32> to vector<8xf32>
    %72 = vector.shape_cast %71 : vector<8xf32> to vector<8x1xf32>
    %73 = tpu.reciprocal %72 {approx = true} : vector<8x1xf32> -> vector<8x1xf32>
    %74 = vector.broadcast %73 : vector<8x1xf32> to vector<8x8xf32>
    %75 = arith.mulf %70, %74 : vector<8x8xf32>
    %76 = arith.truncf %75 : vector<8x8xf32> to vector<8x8xbf16>
    %cst_43 = arith.constant dense<0.000000e+00> : vector<8x8xf32>
    %77 = tpu.matmul %76, %62, %cst_43 {dimension_numbers = #tpu.dot_dimension_numbers<[1], [0], [0], [1], [0, 0, 1, 1], [], []>} : vector<8x8xbf16>, vector<8x8xbf16>, vector<8x8xf32> -> vector<8x8xf32>
    %c0_44 = arith.constant 0 : index
    %c0_45 = arith.constant 0 : index
    %c16_46 = arith.constant 16 : index
    %78 = vector.load %arg4[%c0_44, %c0_45, %c16_46] : memref<1x8x32xf32, #tpu.memory_space<vmem>>, vector<1x8x8xf32>
    %79 = vector.shape_cast %78 : vector<1x8x8xf32> to vector<8x8xf32>
    %80 = vector.shape_cast %77 : vector<8x8xf32> to vector<1x8x8xf32>
    tpu.vector_store %arg4[%c0_44, %c0_45, %c16_46], %80 {strides = array<i32>} : memref<1x8x32xf32, #tpu.memory_space<vmem>>, vector<1x8x8xf32>,
    %c0_47 = arith.constant 0 : index
    %c0_48 = arith.constant 0 : index
    %c24 = arith.constant 24 : index
    %81 = vector.load %arg1[%c0_47, %c0_48, %c24] : memref<1x8x32xf32, #tpu.memory_space<vmem>>, vector<1x8x8xf32>
    %82 = vector.shape_cast %81 : vector<1x8x8xf32> to vector<8x8xf32>
    %83 = arith.truncf %82 : vector<8x8xf32> to vector<8x8xbf16>
    %c0_49 = arith.constant 0 : index
    %c0_50 = arith.constant 0 : index
    %c24_51 = arith.constant 24 : index
    %84 = vector.load %arg2[%c0_49, %c0_50, %c24_51] : memref<1x8x32xf32, #tpu.memory_space<vmem>>, vector<1x8x8xf32>
    %85 = vector.shape_cast %84 : vector<1x8x8xf32> to vector<8x8xf32>
    %86 = arith.truncf %85 : vector<8x8xf32> to vector<8x8xbf16>
    %c0_52 = arith.constant 0 : index
    %c0_53 = arith.constant 0 : index
    %c24_54 = arith.constant 24 : index
    %87 = vector.load %arg3[%c0_52, %c0_53, %c24_54] : memref<1x8x32xf32, #tpu.memory_space<vmem>>, vector<1x8x8xf32>
    %88 = vector.shape_cast %87 : vector<1x8x8xf32> to vector<8x8xf32>
    %89 = arith.truncf %88 : vector<8x8xf32> to vector<8x8xbf16>
    %cst_55 = arith.constant dense<0.000000e+00> : vector<8x8xf32>
    %90 = tpu.matmul %83, %86, %cst_55 {dimension_numbers = #tpu.dot_dimension_numbers<[1], [1], [0], [0], [0, 0, 1, 0], [], []>} : vector<8x8xbf16>, vector<8x8xbf16>, vector<8x8xf32> -> vector<8x8xf32>
    %cst_56 = arith.constant 0.353553385 : f32
    %91 = vector.broadcast %cst_56 : f32 to vector<8x8xf32>
    %92 = arith.mulf %90, %91 : vector<8x8xf32>
    %cst_57 = arith.constant dense<0xFF800000> : vector<8xf32>
    %93 = vector.multi_reduction <maximumf>, %92, %cst_57 [1] : vector<8x8xf32> to vector<8xf32>
    %94 = vector.shape_cast %93 : vector<8xf32> to vector<8x1xf32>
    %95 = vector.broadcast %94 : vector<8x1xf32> to vector<8x8xf32>
    %96 = arith.subf %92, %95 : vector<8x8xf32>
    %97 = math.exp %96 : vector<8x8xf32>
    %cst_58 = arith.constant dense<0.000000e+00> : vector<8xf32>
    %98 = vector.multi_reduction <add>, %97, %cst_58 [1] : vector<8x8xf32> to vector<8xf32>
    %99 = vector.shape_cast %98 : vector<8xf32> to vector<8x1xf32>
    %100 = tpu.reciprocal %99 {approx = true} : vector<8x1xf32> -> vector<8x1xf32>
    %101 = vector.broadcast %100 : vector<8x1xf32> to vector<8x8xf32>
    %102 = arith.mulf %97, %101 : vector<8x8xf32>
    %103 = arith.truncf %102 : vector<8x8xf32> to vector<8x8xbf16>
    %cst_59 = arith.constant dense<0.000000e+00> : vector<8x8xf32>
    %104 = tpu.matmul %103, %89, %cst_59 {dimension_numbers = #tpu.dot_dimension_numbers<[1], [0], [0], [1], [0, 0, 1, 1], [], []>} : vector<8x8xbf16>, vector<8x8xbf16>, vector<8x8xf32> -> vector<8x8xf32>
    %c0_60 = arith.constant 0 : index
    %c0_61 = arith.constant 0 : index
    %c24_62 = arith.constant 24 : index
    %105 = vector.load %arg4[%c0_60, %c0_61, %c24_62] : memref<1x8x32xf32, #tpu.memory_space<vmem>>, vector<1x8x8xf32>
    %106 = vector.shape_cast %105 : vector<1x8x8xf32> to vector<8x8xf32>
    %107 = vector.shape_cast %104 : vector<8x8xf32> to vector<1x8x8xf32>
    tpu.vector_store %arg4[%c0_60, %c0_61, %c24_62], %107 {strides = array<i32>} : memref<1x8x32xf32, #tpu.memory_space<vmem>>, vector<1x8x8xf32>,
    return
  }
  func.func @transform_0(%arg0: i32) -> (i32, i32, i32) {
    %c0_i32 = arith.constant 0 : i32
    %c0_i32_0 = arith.constant 0 : i32
    %c0_i32_1 = arith.constant 0 : i32
    return %arg0, %c0_i32, %c0_i32_0 : i32, i32, i32
  }
  func.func @transform_1(%arg0: i32) -> (i32, i32, i32) {
    %c0_i32 = arith.constant 0 : i32
    %c0_i32_0 = arith.constant 0 : i32
    %c0_i32_1 = arith.constant 0 : i32
    return %arg0, %c0_i32, %c0_i32_0 : i32, i32, i32
  }
  func.func @transform_2(%arg0: i32) -> (i32, i32, i32) {
    %c0_i32 = arith.constant 0 : i32
    %c0_i32_0 = arith.constant 0 : i32
    %c0_i32_1 = arith.constant 0 : i32
    return %arg0, %c0_i32, %c0_i32_0 : i32, i32, i32
  }
  func.func @transform_3(%arg0: i32) -> (i32, i32, i32) {
    %c0_i32 = arith.constant 0 : i32
    %c0_i32_0 = arith.constant 0 : i32
    %c0_i32_1 = arith.constant 0 : i32
    return %arg0, %c0_i32, %c0_i32_0 : i32, i32, i32
  }
}

module attributes {stable_mosaic.version = 11 : i64} {
  func.func @_linear_kernel(%arg0: i32, %arg1: i32, %arg2: i32, %arg3: memref<16x128xf32, #tpu.memory_space<vmem>>, %arg4: memref<128x128xf32, #tpu.memory_space<vmem>>, %arg5: memref<1x128xf32, #tpu.memory_space<vmem>>, %arg6: memref<16x128xf32, #tpu.memory_space<vmem>>, %arg7: memref<16x128xf32, #tpu.memory_space<vmem>>) attributes {dimension_semantics = [#tpu.dimension_semantics<parallel>, #tpu.dimension_semantics<parallel>, #tpu.dimension_semantics<arbitrary>], iteration_bounds = array<i64: 1, 1, 1>, scalar_prefetch = 0 : i64, scratch_operands = 1 : i64, tpu.core_type = #tpu.core_type<tc>, window_params = [{transform_indices = @transform_0, window_bounds = array<i64: 16, 128>}, {transform_indices = @transform_1, window_bounds = array<i64: 128, 128>}, {transform_indices = @transform_2, window_bounds = array<i64: 1, 128>}, {transform_indices = @transform_3, window_bounds = array<i64: 16, 128>}]} {
    %c0_i32 = arith.constant 0 : i32
    %0 = arith.cmpi eq, %arg2, %c0_i32 : i32
    %1 = arith.extui %0 : i1 to i32
    %c0_i32_0 = arith.constant 0 : i32
    %2 = arith.cmpi ne, %1, %c0_i32_0 : i32
    scf.if %2 {
      %cst_10 = arith.constant 0.000000e+00 : f32
      %14 = vector.broadcast %cst_10 : f32 to vector<16x128xf32>
      %c0_11 = arith.constant 0 : index
      %c0_12 = arith.constant 0 : index
      %15 = vector.load %arg7[%c0_11, %c0_12] : memref<16x128xf32, #tpu.memory_space<vmem>>, vector<16x128xf32>
      tpu.vector_store %arg7[%c0_11, %c0_12], %14 {strides = array<i32>} : memref<16x128xf32, #tpu.memory_space<vmem>>, vector<16x128xf32>,
    } else {
    }
    %c0 = arith.constant 0 : index
    %c0_1 = arith.constant 0 : index
    %3 = vector.load %arg7[%c0, %c0_1] : memref<16x128xf32, #tpu.memory_space<vmem>>, vector<16x128xf32>
    %c0_2 = arith.constant 0 : index
    %c0_3 = arith.constant 0 : index
    %4 = vector.load %arg3[%c0_2, %c0_3] : memref<16x128xf32, #tpu.memory_space<vmem>>, vector<16x128xf32>
    %5 = arith.truncf %4 : vector<16x128xf32> to vector<16x128xbf16>
    %c0_4 = arith.constant 0 : index
    %c0_5 = arith.constant 0 : index
    %6 = vector.load %arg4[%c0_4, %c0_5] : memref<128x128xf32, #tpu.memory_space<vmem>>, vector<128x128xf32>
    %7 = arith.truncf %6 : vector<128x128xf32> to vector<128x128xbf16>
    %cst = arith.constant dense<0.000000e+00> : vector<16x128xf32>
    %8 = tpu.matmul %5, %7, %cst {dimension_numbers = #tpu.dot_dimension_numbers<[1], [0], [0], [1], [0, 0, 1, 1], [], []>} : vector<16x128xbf16>, vector<128x128xbf16>, vector<16x128xf32> -> vector<16x128xf32>
    %9 = arith.addf %3, %8 : vector<16x128xf32>
    %c0_6 = arith.constant 0 : index
    %c0_7 = arith.constant 0 : index
    %10 = vector.load %arg7[%c0_6, %c0_7] : memref<16x128xf32, #tpu.memory_space<vmem>>, vector<16x128xf32>
    tpu.vector_store %arg7[%c0_6, %c0_7], %9 {strides = array<i32>} : memref<16x128xf32, #tpu.memory_space<vmem>>, vector<16x128xf32>,
    %c0_i32_8 = arith.constant 0 : i32
    %11 = arith.cmpi eq, %arg2, %c0_i32_8 : i32
    %12 = arith.extui %11 : i1 to i32
    %c0_i32_9 = arith.constant 0 : i32
    %13 = arith.cmpi ne, %12, %c0_i32_9 : i32
    scf.if %13 {
      %c0_10 = arith.constant 0 : index
      %c0_11 = arith.constant 0 : index
      %14 = vector.load %arg7[%c0_10, %c0_11] : memref<16x128xf32, #tpu.memory_space<vmem>>, vector<16x128xf32>
      %c0_12 = arith.constant 0 : index
      %c0_13 = arith.constant 0 : index
      %15 = vector.load %arg5[%c0_12, %c0_13] : memref<1x128xf32, #tpu.memory_space<vmem>>, vector<1x128xf32>
      %16 = vector.broadcast %15 : vector<1x128xf32> to vector<16x128xf32>
      %17 = arith.addf %14, %16 : vector<16x128xf32>
      %cst_14 = arith.constant 0.000000e+00 : f32
      %18 = vector.broadcast %cst_14 : f32 to vector<16x128xf32>
      %19 = arith.maximumf %17, %18 : vector<16x128xf32>
      %c0_15 = arith.constant 0 : index
      %c0_16 = arith.constant 0 : index
      %20 = vector.load %arg6[%c0_15, %c0_16] : memref<16x128xf32, #tpu.memory_space<vmem>>, vector<16x128xf32>
      tpu.vector_store %arg6[%c0_15, %c0_16], %19 {strides = array<i32>} : memref<16x128xf32, #tpu.memory_space<vmem>>, vector<16x128xf32>,
    } else {
    }
    return
  }
  func.func @transform_0(%arg0: i32, %arg1: i32, %arg2: i32) -> (i32, i32) {
    %c0_i32 = arith.constant 0 : i32
    return %arg0, %arg2 : i32, i32
  }
  func.func @transform_1(%arg0: i32, %arg1: i32, %arg2: i32) -> (i32, i32) {
    %c0_i32 = arith.constant 0 : i32
    return %arg2, %arg1 : i32, i32
  }
  func.func @transform_2(%arg0: i32, %arg1: i32, %arg2: i32) -> (i32, i32) {
    %c0_i32 = arith.constant 0 : i32
    %c0_i32_0 = arith.constant 0 : i32
    return %c0_i32, %arg1 : i32, i32
  }
  func.func @transform_3(%arg0: i32, %arg1: i32, %arg2: i32) -> (i32, i32) {
    %c0_i32 = arith.constant 0 : i32
    return %arg0, %arg1 : i32, i32
  }
}

</mosaic_0001>

<bundles_post_ra>
// kernel: transformer_forward.39
= control target key start
LH: loop header
LB: loop body
LE: loop exit
PB: predicated region body
PF: predicated region fallthrough
CT: control target
= control target key end

     0   :  { %v147_v0 = vmov 0.0   ;;  %vm148_vm0 = vmmov 0   ;;  %s232_s1 = inlined_call_operand.vmem [shape: f32[128,128], index: 1, kind: input, shape index: {}]   ;;  %s233_s0 = inlined_call_operand.vmem [shape: f32[16,128], index: 0, kind: input, shape index: {}]   ;;  %s234_s2 = inlined_call_operand.vmem [shape: f32[1,128], index: 2, kind: input, shape index: {}]   ;;  %s235_s3 = inlined_call_operand.vmem [shape: f32[16,128], index: 3, kind: output, shape index: {}]  }
   0x1   :  { %125 = vmatprep.subr.bf16.mxu0 %v147_v0  ;;  %v26_v1 = vld [vmem:[%s232_s1] sm:$0xff]  ;;  %v27_v2 = vld [vmem:[%s232_s1 + $0x8] sm:$0xff]  ;;  %v28_v3 = vld [vmem:[%s232_s1 + $0x10] sm:$0xff]  ;;  %141 = vmatprep.mubr.msk.bf16.mxu0 %vm148_vm0, %v147_v0 }
   0x2   :  { %v42_v4 = vpack.c.bf16 %v27_v2, %v26_v1  ;;  %v29_v5 = vld [vmem:[%s232_s1 + $0x18] sm:$0xff]  ;;  %v30_v7 = vld [vmem:[%s232_s1 + $0x20] sm:$0xff]  ;;  %v31_v8 = vld [vmem:[%s232_s1 + $0x28] sm:$0xff] }
   0x3   :  { %v43_v6 = vpack.c.bf16 %v29_v5, %v28_v3  ;;  %v44_v9 = vpack.c.bf16 %v31_v8, %v30_v7  ;;  %v32_v10 = vld [vmem:[%s232_s1 + $0x30] sm:$0xff]  ;;  %v33_v11 = vld [vmem:[%s232_s1 + $0x38] sm:$0xff]  ;;  %v34_v13 = vld [vmem:[%s232_s1 + $0x40] sm:$0xff] }
   0x4   :  { %126 = vmatpush3.bf16.msra.mxu0 %v42_v4  ;;  %v45_v12 = vpack.c.bf16 %v33_v11, %v32_v10  ;;  %v35_v14 = vld [vmem:[%s232_s1 + $0x48] sm:$0xff]  ;;  %v36_v16 = vld [vmem:[%s232_s1 + $0x50] sm:$0xff]  ;;  %v37_v17 = vld [vmem:[%s232_s1 + $0x58] sm:$0xff] }
   0x5   :  { %127 = vmatprep.subr.bf16.mxu0 %v147_v0  ;;  %v46_v15 = vpack.c.bf16 %v35_v14, %v34_v13  ;;  %v47_v18 = vpack.c.bf16 %v37_v17, %v36_v16  ;;  %v38_v19 = vld [vmem:[%s232_s1 + $0x60] sm:$0xff]  ;;  %v39_v20 = vld [vmem:[%s232_s1 + $0x68] sm:$0xff]  ;;  %v40_v22 = vld [vmem:[%s232_s1 + $0x70] sm:$0xff] }
   0x6   :  { %v48_v21 = vpack.c.bf16 %v39_v20, %v38_v19  ;;  %v41_v23 = vld [vmem:[%s232_s1 + $0x78] sm:$0xff]  ;;  %v23_v25 = vld [vmem:[%s233_s0] sm:$0xff]  ;;  %v24_v26 = vld [vmem:[%s233_s0 + $0x8] sm:$0xff] }
   0x7   :  { %v49_v24 = vpack.c.bf16 %v41_v23, %v40_v22  ;;  %v25_v27 = vpack.c.bf16 %v24_v26, %v23_v25  ;;  %v115_v28 = vld [vmem:[%s234_s2] ss:$0 sm:$0xff] }
   0x8   :  { %128 = vmatpush3.bf16.msra.mxu0 %v43_v6 }
   0x9   :  { %129 = vmatprep.subr.bf16.mxu0 %v147_v0 }
   0xc   :  { %130 = vmatpush3.bf16.msra.mxu0 %v44_v9 }
   0xd   :  { %131 = vmatprep.subr.bf16.mxu0 %v147_v0 }
  0x10   :  { %132 = vmatpush3.bf16.msra.mxu0 %v45_v12 }
  0x11   :  { %133 = vmatprep.subr.bf16.mxu0 %v147_v0 }
  0x14   :  { %134 = vmatpush3.bf16.msra.mxu0 %v46_v15 }
  0x15   :  { %135 = vmatprep.subr.bf16.mxu0 %v147_v0 }
  0x18   :  { %136 = vmatpush3.bf16.msra.mxu0 %v47_v18 }
  0x19   :  { %137 = vmatprep.subr.bf16.mxu0 %v147_v0 }
  0x1c   :  { %138 = vmatpush3.bf16.msra.mxu0 %v48_v21 }
  0x1d   :  { %139 = vmatprep.subr.bf16.mxu0 %v147_v0 }
  0x20   :  { %140 = vmatpush3.bf16.msra.mxu0 %v49_v24 }
  0x23   :  { %142 = vmatmul.mubr.bf16.vlgmr.msra.gmra.mrb[0].mxu0 %v25_v27 }
  0xf6   :  { %v84_v29 = vpop.f32.mrb[0].mxu0 }
  0xf7   :  { %v107_v30 = vadd.f32 %v115_v28, %v84_v29  ;;  %v143_v31 = vpop.f32.mrb[1].mxu0 }
  0xf8   :  { %v87_v32 = vpop.f32.mrb[2].mxu0 }
  0xf9   :  { %109 = vst [vmem:[%s235_s3] sm:$0xff] %v107_v30  ;;  %v108_v33 = vadd.f32 %v115_v28, %v87_v32  ;;  %v144_v34 = vpop.f32.mrb[3].mxu0 }
  0xfb   :  { %110 = vst [vmem:[%s235_s3 + $0x8] sm:$0xff] %v108_v33 }

// kernel: transformer_forward.41
= control target key start
LH: loop header
LB: loop body
LE: loop exit
PB: predicated region body
PF: predicated region fallthrough
CT: control target
= control target key end

     0   :  { %vm28_vm0 = vcmask 261120   ;;  %v213_v0 = vmov 0.0   ;;  %vm214_vm1 = vmmov 0   ;;  %s335_s1 = inlined_call_operand.vmem [shape: f32[128,32], index: 1, kind: input, shape index: {}]   ;;  %s336_s0 = inlined_call_operand.vmem [shape: f32[16,128], index: 0, kind: input, shape index: {}]   ;;  %s337_s2 = inlined_call_operand.vmem [shape: f32[1,32], index: 2, kind: input, shape index: {}]   ;;  %s338_s3 = inlined_call_operand.vmem [shape: f32[16,32], index: 3, kind: input, shape index: {}]   ;;  %s339_s4 = inlined_call_operand.vmem [shape: f32[1,32], index: 4, kind: input, shape index: {}]   ;;  %s340_s5 = inlined_call_operand.vmem [shape: f32[1,32], index: 5, kind: input, shape index: {}]   ;;  %s341_s6 = inlined_call_operand.vmem [shape: f32[16,32], index: 6, kind: output, shape index: {}]  }
   0x1   :  { %187 = vmatprep.subr.bf16.mxu0 %v213_v0  ;;  %v36_v1 = vld [vmem:[%s335_s1] sm:$0xff]  ;;  %v37_v2 = vld [vmem:[%s335_s1 + $0x8] sm:$0xff]  ;;  %v38_v3 = vld [vmem:[%s335_s1 + $0x10] sm:$0xff]  ;;  %203 = vmatprep.mubr.msk.bf16.mxu0 %vm214_vm1, %v213_v0  ;;  %29 = vst.msk [vmem:[#allocation2] sm:$0xff] %vm28_vm0, %v213_v0 }
   0x2   :  { %30 = vst.msk [vmem:[#allocation2 + $0x8] sm:$0xff] %vm28_vm0, %v213_v0  ;;  %v52_v4 = vpack.c.bf16 %v37_v2, %v36_v1  ;;  %v39_v5 = vld [vmem:[%s335_s1 + $0x18] sm:$0xff]  ;;  %v40_v7 = vld [vmem:[%s335_s1 + $0x20] sm:$0xff]  ;;  %v41_v8 = vld [vmem:[%s335_s1 + $0x28] sm:$0xff] }
   0x3   :  { %v53_v6 = vpack.c.bf16 %v39_v5, %v38_v3  ;;  %v54_v9 = vpack.c.bf16 %v41_v8, %v40_v7  ;;  %v42_v10 = vld [vmem:[%s335_s1 + $0x30] sm:$0xff]  ;;  %v43_v11 = vld [vmem:[%s335_s1 + $0x38] sm:$0xff]  ;;  %v44_v13 = vld [vmem:[%s335_s1 + $0x40] sm:$0xff] }
   0x4   :  { %188 = vmatpush3.bf16.msra.mxu0 %v52_v4  ;;  %v55_v12 = vpack.c.bf16 %v43_v11, %v42_v10  ;;  %v45_v14 = vld [vmem:[%s335_s1 + $0x48] sm:$0xff]  ;;  %v46_v16 = vld [vmem:[%s335_s1 + $0x50] sm:$0xff]  ;;  %v47_v17 = vld [vmem:[%s335_s1 + $0x58] sm:$0xff] }
   0x5   :  { %189 = vmatprep.subr.bf16.mxu0 %v213_v0  ;;  %v56_v15 = vpack.c.bf16 %v45_v14, %v44_v13  ;;  %v57_v18 = vpack.c.bf16 %v47_v17, %v46_v16  ;;  %v48_v19 = vld [vmem:[%s335_s1 + $0x60] sm:$0xff]  ;;  %v49_v20 = vld [vmem:[%s335_s1 + $0x68] sm:$0xff]  ;;  %v50_v22 = vld [vmem:[%s335_s1 + $0x70] sm:$0xff] }
   0x6   :  { %v58_v21 = vpack.c.bf16 %v49_v20, %v48_v19  ;;  %v51_v23 = vld [vmem:[%s335_s1 + $0x78] sm:$0xff]  ;;  %v33_v25 = vld [vmem:[%s336_s0] sm:$0xff]  ;;  %v34_v26 = vld [vmem:[%s336_s0 + $0x8] sm:$0xff] }
   0x7   :  { %v59_v24 = vpack.c.bf16 %v51_v23, %v50_v22  ;;  %v35_v27 = vpack.c.bf16 %v34_v26, %v33_v25  ;;  %v175_v36 = vld [vmem:[%s337_s2] ss:$0 sm:$0xff]  ;;  %v121_v41 = vld [vmem:[%s338_s3 + $0x8] sm:$0xff] }
   0x8   :  { %190 = vmatpush3.bf16.msra.mxu0 %v53_v6  ;;  %v31_v28 = vld [vmem:[#allocation2] sm:$0xff] }
   0x9   :  { %191 = vmatprep.subr.bf16.mxu0 %v213_v0  ;;  %v32_v30 = vld [vmem:[#allocation2 + $0x8] sm:$0xff]  ;;  %v120_v38 = vld [vmem:[%s338_s3] sm:$0xff] }
   0xa   :  { %v177_v2 = vld [vmem:[%s340_s5] ss:$0 sm:$0xff] }
   0xc   :  { %192 = vmatpush3.bf16.msra.mxu0 %v54_v9 }
   0xd   :  { %193 = vmatprep.subr.bf16.mxu0 %v213_v0 }
  0x10   :  { %194 = vmatpush3.bf16.msra.mxu0 %v55_v12 }
  0x11   :  { %195 = vmatprep.subr.bf16.mxu0 %v213_v0 }
  0x14   :  { %196 = vmatpush3.bf16.msra.mxu0 %v56_v15 }
  0x15   :  { %197 = vmatprep.subr.bf16.mxu0 %v213_v0 }
  0x18   :  { %198 = vmatpush3.bf16.msra.mxu0 %v57_v18 }
  0x19   :  { %199 = vmatprep.subr.bf16.mxu0 %v213_v0 }
  0x1c   :  { %200 = vmatpush3.bf16.msra.mxu0 %v58_v21 }
  0x1d   :  { %201 = vmatprep.subr.bf16.mxu0 %v213_v0  ;;  %v176_v0 = vld [vmem:[%s339_s4] ss:$0 sm:$0xff] }
  0x20   :  { %202 = vmatpush3.bf16.msra.mxu0 %v59_v24 }
  0x23   :  { %204 = vmatmul.mubr.bf16.vlgmr.msra.gmra.mrb[0].mxu0 %v35_v27 }
  0xf6   :  { %v94_v29 = vpop.f32.mrb[0].mxu0 }
  0xf7   :  { %v101_v31 = vadd.f32 %v94_v29, %v31_v28  ;;  %v205_v32 = vpop.f32.mrb[1].mxu0 }
  0xf8   :  { %v97_v33 = vpop.f32.mrb[2].mxu0 }
  0xf9   :  { %104 = vst.msk [vmem:[#allocation2] sm:$0xff] %vm28_vm0, %v101_v31  ;;  %v102_v34 = vadd.f32 %v97_v33, %v32_v30  ;;  %v206_v35 = vpop.f32.mrb[3].mxu0 }
  0xfb   :  { %105 = vst.msk [vmem:[#allocation2 + $0x8] sm:$0xff] %vm28_vm0, %v102_v34 }
 0x100   :  { %v109_v37 = vld [vmem:[#allocation2] sm:$0xff] }
 0x101   :  { %v118_v39 = vadd.f32 %v175_v36, %v109_v37 }
 0x102   :  { %v110_v40 = vld [vmem:[#allocation2 + $0x8] sm:$0xff] }
 0x103   :  { %v122_v42 = vadd.f32 %v120_v38, %v118_v39  ;;  %v119_v43 = vadd.f32 %v175_v36, %v110_v40 }
 0x105   :  { %v124_v44 = vsel %vm28_vm0, %v122_v42, 0.0  ;;  %v123_v45 = vadd.f32 %v121_v41, %v119_v43 }
 0x106   :  { %125 = vadd.xlane.f32.xlu0 %v124_v44 }
 0x107   :  { %v127_v46 = vsel %vm28_vm0, %v123_v45, 0.0 }
 0x10a   :  { %128 = vadd.xlane.f32.xlu0 %v127_v46 }
 0x193   :  { %v126_v47 = vpop.xlane.xlu0 %125 }
 0x194   :  { %v131_v48 = vmul.f32 0.03125, %v126_v47 }
 0x196   :  { %v133_v49 = vsub.f32 %v122_v42, %v131_v48 }
 0x197   :  { %v129_v50 = vpop.xlane.xlu0 %128 }
 0x198   :  { %v132_v51 = vmul.f32 0.03125, %v129_v50  ;;  %v135_v52 = vmul.f32 %v133_v49, %v133_v49 }
 0x19a   :  { %v134_v53 = vsub.f32 %v123_v45, %v132_v51  ;;  %v137_v54 = vsel %vm28_vm0, %v135_v52, 0.0 }
 0x19b   :  { %138 = vadd.xlane.f32.xlu1 %v137_v54 }
 0x19c   :  { %v136_v55 = vmul.f32 %v134_v53, %v134_v53 }
 0x19e   :  { %v140_v56 = vsel %vm28_vm0, %v136_v55, 0.0 }
 0x19f   :  { %141 = vadd.xlane.f32.xlu1 %v140_v56 }
 0x228   :  { %v139_v57 = vpop.xlane.xlu1 %138 }
 0x229   :  { %v143_v58 = vmul.f32 0.03125, %v139_v57 }
 0x22b   :  { %v145_v59 = vadd.f32 1e-05, %v143_v58 }
 0x22c   :  { %v142_v60 = vpop.xlane.xlu1 %141 }
 0x22d   :  { %209 = vrsqrt.f32 %v145_v59  ;;  %v144_v61 = vmul.f32 0.03125, %v142_v60 }
 0x22f   :  { %v146_v62 = vadd.f32 1e-05, %v144_v61 }
 0x231   :  { %211 = vrsqrt.f32 %v146_v62 }
 0x237   :  { %v210_v63 = vpop.eup %209 }
 0x238   :  { %v149_v1 = vmul.f32 %v210_v63, %v133_v49 }
 0x23a   :  { %v158_v3 = vmul.f32 %v176_v0, %v149_v1 }
 0x23b   :  { %v212_v4 = vpop.eup %211 }
 0x23c   :  { %v167_v5 = vadd.f32 %v177_v2, %v158_v3  ;;  %v150_v6 = vmul.f32 %v212_v4, %v134_v53 }
 0x23e   :  { %169 = vst.msk [vmem:[%s341_s6] sm:$0xff] %vm28_vm0, %v167_v5  ;;  %v159_v7 = vmul.f32 %v176_v0, %v150_v6 }
 0x240   :  { %v168_v8 = vadd.f32 %v177_v2, %v159_v7 }
 0x242   :  { %170 = vst.msk [vmem:[%s341_s6 + $0x8] sm:$0xff] %vm28_vm0, %v168_v8 }

// kernel: transformer_forward.40
= control target key start
LH: loop header
LB: loop body
LE: loop exit
PB: predicated region body
PF: predicated region fallthrough
CT: control target
= control target key end

     0   :  { %s933_s12 = smov 0   ;;  %s1038_s0 = inlined_call_operand.vmem [shape: f32[2,8,32], index: 0, kind: input, shape index: {}]   ;;  %s1039_s1 = inlined_call_operand.vmem [shape: f32[2,8,32], index: 1, kind: input, shape index: {}]   ;;  %s1040_s2 = inlined_call_operand.vmem [shape: f32[2,8,32], index: 2, kind: input, shape index: {}]   ;;  %s1041_s3 = inlined_call_operand.vmem [shape: f32[2,8,32], index: 3, kind: output, shape index: {}]  }
   0x1 LB: > { %s780_s13 = sadd.s32 4294967295, %s902_s12   ;;  %p784_p0 = scmp.ge.s32.totalorder %s902_s12, 1  ;;  %s902_s12 = sphi %s933_s12, %s13_s12  }
   0x2   : > { %p154_p1 = scmp.lt.s32.totalorder %s902_s12, 3 }
   0x4   : > { %p155_p2 = pnand %p784_p0, %p154_p1 }
   0x5   : > { %p184_p3 = scmp.lt.s32.totalorder (!%p155_p2), %s780_s13, 1  ;;  %v904_v0 = vmov (!%p155_p2), 0.0   ;;  %vm905_vm0 = vmmov (!%p155_p2), 0   ;;  %vm213_vm1 = vcmask (!%p155_p2), 64512   ;;  %v201_v6 = vlaneseq (!%p155_p2)  ;;  %s907_s21 = smov (!%p155_p2), 120  }
   0x6   : > { %158 = sbr.rel (%p155_p2) target bundleno = 1480 (0x5c8), region = 32  ;;  %815 = vmatprep.subr.bf16.mxu0 (!%p155_p2), %v904_v0  ;;  %817 = vmatprep.mubr.msk.bf16.mxu0 (!%p155_p2), %vm905_vm0, %v904_v0  ;;  %v906_v10 = vmov (!%p155_p2), -1e+30   ;;  %s908_s22 = smov (!%p155_p2), 112   ;;  %vm277_vm3 = vcmask (!%p155_p2), 1043456   ;;  %vm447_vm4 = vcmask (!%p155_p2), 130112  }
   0x7   : > { %821 = vmatprep.subr.bf16.mxu1 (!%p155_p2), %v904_v0  ;;  %823 = vmatprep.mubr.msk.bf16.mxu1 (!%p155_p2), %vm905_vm0, %v904_v0  ;;  %v202_v7 = vshrl.u32 (!%p155_p2), %v201_v6, 7  ;;  %v204_v8 = vand.u32 (!%p155_p2), 127, %v201_v6  ;;  %s909_s23 = smov (!%p155_p2), 104   ;;  %s910_s30 = smov (!%p155_p2), 8   ;;  %vm574_vm5 = vcmask (!%p155_p2), 195712   ;;  %vm701_vm6 = vcmask (!%p155_p2), 261312  }
   0x8   : > { %s911_s4 = smov (!%p155_p2), 16   ;;  %s912_s5 = smov (!%p155_p2), 24  }
   0x9   : > { %vm205_vm2 = vcmp.le.s32.totalorder (!%p155_p2), %v204_v8, %v202_v7 }
   0xa   : > { %v962_v11 = vsel (!%p155_p2), %vm205_vm2, 0.0, %v906_v10 }
   0xd   : > { %s1043_s13 = smov (!%p184_p3, %s780_s13), 1 }
   0xe   : > { %s947_s14 = sshll.u32 %s1043_s13, 3 }
   0xf   : > { %s191_s17 = scalar_lea.vmem %s1039_s1, %s947_s14  ;;  %s187_s20 = scalar_lea.vmem %s1038_s0, %s947_s14 }
  0x10   : > { %v209_v1 = vld [vmem:[%s191_s17] sm:$0xff]  ;;  %s195_s26 = scalar_lea.vmem %s1040_s2, %s947_s14  ;;  %s1001_s29 = scalar_lea.vmem %s1041_s3, %s947_s14 }
  0x11   : > { %v210_v2 = vpack.c.bf16 %v209_v1, %v209_v1  ;;  %v207_v4 = vld [vmem:[%s187_s20] sm:$0xff] }
  0x12   : > { %v208_v5 = vpack.c.bf16 %v207_v4, %v207_v4  ;;  %v211_v23 = vld [vmem:[%s195_s26] sm:$0xff] }
  0x13   : > { %v218_v3 = vsel %vm213_vm1, %v210_v2, 0  ;;  %332 = vrot.lane.b32.xlu1 %v210_v2, %s907_s21  ;;  %v976_v24 = vpack.c.bf16 %v211_v23, %v211_v23 }
  0x14   : > { %816 = vmatpush3.bf16.xpose.msra.mxu0 %v218_v3 }
  0x15   : > { %833 = vmatprep.subr.bf16.mxu0 %v904_v0  ;;  %v279_v25 = vsel %vm277_vm3, %v976_v24, 0 }
  0x16   : > { %822 = vmatpush3.bf16.msra.mxu1 %v279_v25 }
  0x17   : > { %329 = vrot.lane.b32.xlu1 %v208_v5, %s907_s21  ;;  %827 = vmatprep.subr.bf16.mxu1 %v904_v0 }
  0x1b   : > { %818 = vmatmul.mubr.msk.bf16.vlgmr.msra.gmra.mrb[0].mxu0 %vm213_vm1, %v208_v5  ;;  %456 = vrot.lane.b32.xlu1 %v208_v5, %s908_s22 }
  0x1c   : > { %835 = vmatprep.mubr.msk.bf16.mxu0 %vm905_vm0, %v904_v0 }
  0x1f   : > { %586 = vrot.lane.b32.xlu1 %v210_v2, %s909_s23 }
  0x23   : > { %583 = vrot.lane.b32.xlu1 %v208_v5, %s909_s23 }
  0x85   : > { %v333_v28 = vpop.permute.xlu1 %332 }
  0x86   : > { %v338_v30 = vsel %vm213_vm1, %v333_v28, 0 }
  0x89   : > { %v330_v32 = vpop.permute.xlu1 %329 }
  0x8d   : > { %v457_v34 = vpop.permute.xlu1 %456 }
  0x91   : > { %v587_v36 = vpop.permute.xlu1 %586 }
  0x92   : > { %v592_v37 = vsel %vm213_vm1, %v587_v36, 0 }
  0x95   : > { %v584_v38 = vpop.permute.xlu1 %583 }
  0xee   : > { %v254_v9 = vpop.f32.mrb[0].mxu0 }
  0xef   : > { %v260_v12 = vmul.f32 0.35355338, %v254_v9  ;;  %v819_v13 = vpop.f32.mrb[1].mxu0 }
  0xf0   : > { %v257_v14 = vpop.f32.mrb[2].mxu0 }
  0xf1   : > { %v820_v15 = vpop.f32.mrb[3].mxu0  ;;  %v261_v16 = vadd.f32 %v260_v12, %v962_v11 }
  0xf3   : > { %v262_v17 = vsel %vm213_vm1, %v261_v16, -inf }
  0xf4   : > { %263 = vmax.xlane.f32.xlu0 %v262_v17 }
 0x181   : > { %v264_v18 = vpop.xlane.xlu0 %263 }
 0x182   : > { %v265_v19 = vsub.f32 %v261_v16, %v264_v18 }
 0x184   : > { %v266_v20 = vmul.f32 1.442695, %v265_v19 }
 0x186   : > { %880 = vpow2.f32 %v266_v20 }
 0x190   : > { %v881_v21 = vpop.eup %880 }
 0x191   : > { %v268_v22 = vsel %vm213_vm1, %v881_v21, 0.0 }
 0x192   : > { %269 = vadd.xlane.f32.xlu0 %v268_v22 }
 0x1a8   : > { %459 = vrot.lane.b32.xlu0 %v210_v2, %s908_s22 }
 0x21f   : > { %v270_v26 = vpop.xlane.xlu0 %269 }
 0x220   : > { %882 = vrcp.f32 %v270_v26 }
 0x223   : > { %v460_v33 = vpop.permute.xlu0 %459 }
 0x224   : > { %v465_v35 = vsel %vm213_vm1, %v460_v33, 0 }
 0x22a   : > { %v883_v27 = vpop.eup %882 }
 0x22b   : > { %v272_v29 = vmul.f32 %v883_v27, %v881_v21 }
 0x22d   : > { %v273_v31 = vpack.c.bf16 %v272_v29, %v272_v29 }
 0x22f   : > { %824 = vmatmul.mubr.msk.bf16.vlgmr.msra.gmra.mrb[0].mxu1 %vm213_vm1, %v273_v31 }
 0x230   : > { %828 = vmatpush3.bf16.xpose.msra.mxu1 %v338_v30  ;;  %829 = vmatprep.mubr.msk.bf16.mxu1 %vm905_vm0, %v904_v0 }
 0x231   : > { %839 = vmatprep.subr.bf16.mxu1 %v904_v0 }
 0x237   : > { %830 = vmatmul.mubr.msk.bf16.vlgmr.msra.gmra.mrb[4].mxu1 %vm213_vm1, %v330_v32 }
 0x238   : > { %840 = vmatpush3.bf16.xpose.msra.mxu1 %v465_v35  ;;  %841 = vmatprep.mubr.msk.bf16.mxu1 %vm905_vm0, %v904_v0 }
 0x239   : > { %851 = vmatprep.subr.bf16.mxu1 %v904_v0 }
 0x23f   : > { %842 = vmatmul.mubr.msk.bf16.vlgmr.msra.gmra.mrb[8].mxu1 %vm213_vm1, %v457_v34 }
 0x240   : > { %852 = vmatpush3.bf16.xpose.msra.mxu1 %v592_v37  ;;  %853 = vmatprep.mubr.msk.bf16.mxu1 %vm905_vm0, %v904_v0 }
 0x247   : > { %854 = vmatmul.mubr.msk.bf16.vlgmr.msra.gmra.mrb[12].mxu1 %vm213_vm1, %v584_v38 }
 0x302   : > { %v315_v39 = vpop.f32.mrb[0].mxu1 }
 0x303   : > { %321 = vst.msk [vmem:[%s1001_s29] sm:$0xff] %vm213_vm1, %v315_v39  ;;  %v825_v40 = vpop.f32.mrb[1].mxu1 }
 0x304   : > { %v318_v41 = vpop.f32.mrb[2].mxu1 }
 0x305   : > { %v826_v42 = vpop.f32.mrb[3].mxu1 }
 0x30a   : > { %v374_v43 = vpop.f32.mrb[4].mxu1 }
 0x30b   : > { %v380_v44 = vmul.f32 0.35355338, %v374_v43  ;;  %v831_v45 = vpop.f32.mrb[5].mxu1 }
 0x30c   : > { %v377_v46 = vpop.f32.mrb[6].mxu1 }
 0x30d   : > { %v832_v47 = vpop.f32.mrb[7].mxu1  ;;  %v381_v48 = vadd.f32 %v380_v44, %v962_v11 }
 0x30f   : > { %v382_v49 = vsel %vm213_vm1, %v381_v48, -inf }
 0x310   : > { %383 = vmax.xlane.f32.xlu1 %v382_v49 }
 0x312   : > { %v501_v50 = vpop.f32.mrb[8].mxu1 }
 0x313   : > { %v507_v51 = vmul.f32 0.35355338, %v501_v50  ;;  %v843_v52 = vpop.f32.mrb[9].mxu1 }
 0x314   : > { %v504_v53 = vpop.f32.mrb[10].mxu1 }
 0x315   : > { %v508_v54 = vadd.f32 %v507_v51, %v962_v11  ;;  %v844_v55 = vpop.f32.mrb[11].mxu1 }
 0x317   : > { %v509_v56 = vsel %vm213_vm1, %v508_v54, -inf }
 0x318   : > { %510 = vmax.xlane.f32.xlu0 %v509_v56 }
 0x31a   : > { %v628_v57 = vpop.f32.mrb[12].mxu1 }
 0x31b   : > { %v634_v58 = vmul.f32 0.35355338, %v628_v57  ;;  %v855_v59 = vpop.f32.mrb[13].mxu1 }
 0x31c   : > { %v631_v60 = vpop.f32.mrb[14].mxu1 }
 0x31d   : > { %v635_v61 = vadd.f32 %v634_v58, %v962_v11  ;;  %v856_v62 = vpop.f32.mrb[15].mxu1 }
 0x31f   : > { %v636_v63 = vsel %vm213_vm1, %v635_v61, -inf }
 0x320   : > { %637 = vmax.xlane.f32.xlu1 %v636_v63 }
 0x39d   : > { %v384_v1 = vpop.xlane.xlu1 %383 }
 0x39e   : > { %v385_v2 = vsub.f32 %v381_v48, %v384_v1 }
 0x3a0   : > { %v386_v3 = vmul.f32 1.442695, %v385_v2 }
 0x3a2   : > { %884 = vpow2.f32 %v386_v3 }
 0x3a5   : > { %v511_v4 = vpop.xlane.xlu0 %510 }
 0x3a6   : > { %v512_v5 = vsub.f32 %v508_v54, %v511_v4 }
 0x3a8   : > { %v513_v6 = vmul.f32 1.442695, %v512_v5 }
 0x3aa   : > { %886 = vpow2.f32 %v513_v6 }
 0x3ac   : > { %v885_v7 = vpop.eup %884 }
 0x3ad   : > { %v388_v8 = vsel %vm213_vm1, %v885_v7, 0.0  ;;  %v638_v11 = vpop.xlane.xlu1 %637 }
 0x3ae   : > { %389 = vadd.xlane.f32.xlu1 %v388_v8  ;;  %v639_v12 = vsub.f32 %v635_v61, %v638_v11 }
 0x3b0   : > { %v640_v13 = vmul.f32 1.442695, %v639_v12 }
 0x3b2   : > { %888 = vpow2.f32 %v640_v13 }
 0x3b4   : > { %v887_v9 = vpop.eup %886 }
 0x3b5   : > { %v515_v10 = vsel %vm213_vm1, %v887_v9, 0.0 }
 0x3b6   : > { %516 = vadd.xlane.f32.xlu0 %v515_v10 }
 0x3bc   : > { %v889_v14 = vpop.eup %888 }
 0x3bd   : > { %v642_v15 = vsel %vm213_vm1, %v889_v14, 0.0 }
 0x3bf   : > { %522 = vrot.lane.b32.xlu1 %v976_v24, %s908_s22 }
 0x3cc   : > { %395 = vrot.lane.b32.xlu0 %v976_v24, %s907_s21 }
 0x3e3   : > { %643 = vadd.xlane.f32.xlu1 %v642_v15 }
 0x3f4   : > { %649 = vrot.lane.b32.xlu1 %v976_v24, %s909_s23 }
 0x43b   : > { %v390_v16 = vpop.xlane.xlu1 %389 }
 0x43c   : > { %890 = vrcp.f32 %v390_v16 }
 0x43f   : > { %v523_v22 = vpop.permute.xlu1 %522 }
 0x440   : > { %v528_v25 = vsel %vm277_vm3, %v523_v22, 0 }
 0x443   : > { %v517_v17 = vpop.xlane.xlu0 %516 }
 0x444   : > { %892 = vrcp.f32 %v517_v17 }
 0x446   : > { %v891_v18 = vpop.eup %890 }
 0x447   : > { %v392_v19 = vmul.f32 %v891_v18, %v885_v7  ;;  %v396_v20 = vpop.permute.xlu0 %395 }
 0x448   : > { %v401_v21 = vsel %vm277_vm3, %v396_v20, 0 }
 0x449   : > { %834 = vmatpush3.bf16.msra.mxu0 %v401_v21  ;;  %v393_v23 = vpack.c.bf16 %v392_v19, %v392_v19 }
 0x44a   : > { %845 = vmatprep.subr.bf16.mxu0 %v904_v0 }
 0x44c   : > { %836 = vmatmul.mubr.msk.bf16.vlgmr.msra.gmra.mrb[4].mxu0 %vm213_vm1, %v393_v23 }
 0x44d   : > { %846 = vmatpush3.bf16.msra.mxu0 %v528_v25  ;;  %847 = vmatprep.mubr.msk.bf16.mxu0 %vm905_vm0, %v904_v0 }
 0x44e   : > { %v893_v24 = vpop.eup %892  ;;  %857 = vmatprep.subr.bf16.mxu0 %v904_v0 }
 0x44f   : > { %v519_v26 = vmul.f32 %v893_v24, %v887_v9 }
 0x451   : > { %v520_v27 = vpack.c.bf16 %v519_v26, %v519_v26 }
 0x454   : > { %848 = vmatmul.mubr.msk.bf16.vlgmr.msra.gmra.mrb[8].mxu0 %vm213_vm1, %v520_v27 }
 0x455   : > { %859 = vmatprep.mubr.msk.bf16.mxu0 %vm905_vm0, %v904_v0 }
 0x470   : > { %v644_v28 = vpop.xlane.xlu1 %643 }
 0x471   : > { %894 = vrcp.f32 %v644_v28 }
 0x474   : > { %v650_v29 = vpop.permute.xlu1 %649 }
 0x475   : > { %v655_v30 = vsel %vm277_vm3, %v650_v29, 0 }
 0x476   : > { %858 = vmatpush3.bf16.msra.mxu0 %v655_v30 }
 0x47b   : > { %v895_v31 = vpop.eup %894 }
 0x47c   : > { %v646_v32 = vmul.f32 %v895_v31, %v889_v14 }
 0x47e   : > { %v647_v33 = vpack.c.bf16 %v646_v32, %v646_v32 }
 0x480   : > { %860 = vmatmul.mubr.msk.bf16.vlgmr.msra.gmra.mrb[12].mxu0 %vm213_vm1, %v647_v33 }
 0x51f   : > { %v437_v34 = vpop.f32.mrb[4].mxu0 }
 0x520   : > { %444 = vrot.lane.b32.xlu0 %v437_v34, %s910_s30  ;;  %v837_v35 = vpop.f32.mrb[5].mxu0 }
 0x521   : > { %v440_v36 = vpop.f32.mrb[6].mxu0 }
 0x522   : > { %v838_v37 = vpop.f32.mrb[7].mxu0 }
 0x527   : > { %v564_v38 = vpop.f32.mrb[8].mxu0 }
 0x528   : > { %571 = vrot.lane.b32.xlu1 %v564_v38, %s911_s4  ;;  %v849_v0 = vpop.f32.mrb[9].mxu0 }
 0x529   : > { %v567_v39 = vpop.f32.mrb[10].mxu0 }
 0x52a   : > { %v850_v40 = vpop.f32.mrb[11].mxu0 }
 0x553   : > { %v691_v41 = vpop.f32.mrb[12].mxu0 }
 0x554   : > { %698 = vrot.lane.b32.xlu0 %v691_v41, %s912_s5  ;;  %v861_v42 = vpop.f32.mrb[13].mxu0 }
 0x555   : > { %v694_v43 = vpop.f32.mrb[14].mxu0 }
 0x556   : > { %v862_v44 = vpop.f32.mrb[15].mxu0 }
 0x592   : > { %v445_v45 = vpop.permute.xlu0 %444 }
 0x593   : > { %448 = vst.msk [vmem:[%s1001_s29] sm:$0xff] %vm447_vm4, %v445_v45 }
 0x59a   : > { %v572_v46 = vpop.permute.xlu1 %571 }
 0x59b   : > { %575 = vst.msk [vmem:[%s1001_s29] sm:$0xff] %vm574_vm5, %v572_v46 }
 0x5c6   : > { %v699_v47 = vpop.permute.xlu0 %698 }
 0x5c7   : > { %702 = vst.msk [vmem:[%s1001_s29] sm:$0xff] %vm701_vm6, %v699_v47 }
 0x5c8 PF: > { %s13_s12 = sadd.s32 1, %s902_s12  }
 0x5c9   : > { %p10_p4 = scmp.ge.s32.totalorder %s13_s12, 4  }
 0x5cb   :  { %12 = sbr.rel (!%p10_p4) target bundleno = 1 (0x1), region = 68 }

// kernel: transformer_forward.30
= control target key start
LH: loop header
LB: loop body
LE: loop exit
PB: predicated region body
PF: predicated region fallthrough
CT: control target
= control target key end

     0   :  { %s921_s12 = smov 0   ;;  %s1020_s0 = inlined_call_operand.vmem [shape: f32[2,8,32], index: 0, kind: input, shape index: {}]   ;;  %s1021_s1 = inlined_call_operand.vmem [shape: f32[2,8,32], index: 1, kind: input, shape index: {}]   ;;  %s1022_s2 = inlined_call_operand.vmem [shape: f32[2,8,32], index: 2, kind: input, shape index: {}]   ;;  %s1023_s3 = inlined_call_operand.vmem [shape: f32[2,8,32], index: 3, kind: output, shape index: {}]  }
   0x1 LB: > { %s770_s13 = sadd.s32 4294967295, %s891_s12   ;;  %p774_p0 = scmp.ge.s32.totalorder %s891_s12, 1  ;;  %s891_s12 = sphi %s921_s12, %s13_s12  }
   0x2   : > { %p154_p1 = scmp.lt.s32.totalorder %s891_s12, 3 }
   0x4   : > { %p155_p2 = pnand %p774_p0, %p154_p1 }
   0x5   : > { %p184_p3 = scmp.lt.s32.totalorder (!%p155_p2), %s770_s13, 1  ;;  %v893_v0 = vmov (!%p155_p2), 0.0   ;;  %vm894_vm0 = vmmov (!%p155_p2), 0   ;;  %vm207_vm1 = vcmask (!%p155_p2), 64512   ;;  %s895_s21 = smov (!%p155_p2), 120   ;;  %vm270_vm2 = vcmask (!%p155_p2), 1043456  }
   0x6   : > { %158 = sbr.rel (%p155_p2) target bundleno = 1476 (0x5c4), region = 32  ;;  %805 = vmatprep.subr.bf16.mxu0 (!%p155_p2), %v893_v0  ;;  %807 = vmatprep.mubr.msk.bf16.mxu0 (!%p155_p2), %vm894_vm0, %v893_v0  ;;  %s896_s22 = smov (!%p155_p2), 112   ;;  %vm439_vm3 = vcmask (!%p155_p2), 130112   ;;  %vm565_vm4 = vcmask (!%p155_p2), 195712   ;;  %vm691_vm5 = vcmask (!%p155_p2), 261312  }
   0x7   : > { %811 = vmatprep.subr.bf16.mxu1 (!%p155_p2), %v893_v0  ;;  %813 = vmatprep.mubr.msk.bf16.mxu1 (!%p155_p2), %vm894_vm0, %v893_v0  ;;  %s897_s23 = smov (!%p155_p2), 104   ;;  %s898_s30 = smov (!%p155_p2), 8  }
   0x8   : > { %s899_s4 = smov (!%p155_p2), 16   ;;  %s900_s5 = smov (!%p155_p2), 24  }
   0xd   : > { %s1025_s13 = smov (!%p184_p3, %s770_s13), 1 }
   0xe   : > { %s935_s14 = sshll.u32 %s1025_s13, 3 }
   0xf   : > { %s191_s17 = scalar_lea.vmem %s1021_s1, %s935_s14  ;;  %s187_s20 = scalar_lea.vmem %s1020_s0, %s935_s14 }
  0x10   : > { %v203_v1 = vld [vmem:[%s191_s17] sm:$0xff]  ;;  %s195_s26 = scalar_lea.vmem %s1022_s2, %s935_s14  ;;  %s986_s29 = scalar_lea.vmem %s1023_s3, %s935_s14 }
  0x11   : > { %v204_v2 = vpack.c.bf16 %v203_v1, %v203_v1  ;;  %v201_v4 = vld [vmem:[%s187_s20] sm:$0xff] }
  0x12   : > { %v202_v5 = vpack.c.bf16 %v201_v4, %v201_v4  ;;  %v205_v17 = vld [vmem:[%s195_s26] sm:$0xff] }
  0x13   : > { %v212_v3 = vsel %vm207_vm1, %v204_v2, 0  ;;  %325 = vrot.lane.b32.xlu1 %v204_v2, %s895_s21  ;;  %v961_v18 = vpack.c.bf16 %v205_v17, %v205_v17 }
  0x14   : > { %806 = vmatpush3.bf16.xpose.msra.mxu0 %v212_v3 }
  0x15   : > { %823 = vmatprep.subr.bf16.mxu0 %v893_v0  ;;  %v272_v19 = vsel %vm270_vm2, %v961_v18, 0 }
  0x16   : > { %812 = vmatpush3.bf16.msra.mxu1 %v272_v19 }
  0x17   : > { %322 = vrot.lane.b32.xlu1 %v202_v5, %s895_s21  ;;  %817 = vmatprep.subr.bf16.mxu1 %v893_v0 }
  0x1b   : > { %808 = vmatmul.mubr.msk.bf16.vlgmr.msra.gmra.mrb[0].mxu0 %vm207_vm1, %v202_v5  ;;  %448 = vrot.lane.b32.xlu1 %v202_v5, %s896_s22 }
  0x1c   : > { %825 = vmatprep.mubr.msk.bf16.mxu0 %vm894_vm0, %v893_v0 }
  0x1f   : > { %577 = vrot.lane.b32.xlu1 %v204_v2, %s897_s23 }
  0x23   : > { %574 = vrot.lane.b32.xlu1 %v202_v5, %s897_s23 }
  0x85   : > { %v326_v22 = vpop.permute.xlu1 %325 }
  0x86   : > { %v331_v24 = vsel %vm207_vm1, %v326_v22, 0 }
  0x89   : > { %v323_v26 = vpop.permute.xlu1 %322 }
  0x8d   : > { %v449_v28 = vpop.permute.xlu1 %448 }
  0x91   : > { %v578_v30 = vpop.permute.xlu1 %577 }
  0x92   : > { %v583_v31 = vsel %vm207_vm1, %v578_v30, 0 }
  0x95   : > { %v575_v32 = vpop.permute.xlu1 %574 }
  0xee   : > { %v248_v6 = vpop.f32.mrb[0].mxu0 }
  0xef   : > { %v254_v7 = vmul.f32 0.35355338, %v248_v6  ;;  %v809_v8 = vpop.f32.mrb[1].mxu0 }
  0xf0   : > { %v251_v9 = vpop.f32.mrb[2].mxu0 }
  0xf1   : > { %v810_v10 = vpop.f32.mrb[3].mxu0  ;;  %v255_v11 = vsel %vm207_vm1, %v254_v7, -inf }
  0xf2   : > { %256 = vmax.xlane.f32.xlu0 %v255_v11 }
 0x17f   : > { %v257_v12 = vpop.xlane.xlu0 %256 }
 0x180   : > { %v258_v13 = vsub.f32 %v254_v7, %v257_v12 }
 0x182   : > { %v259_v14 = vmul.f32 1.442695, %v258_v13 }
 0x184   : > { %869 = vpow2.f32 %v259_v14 }
 0x18e   : > { %v870_v15 = vpop.eup %869 }
 0x18f   : > { %v261_v16 = vsel %vm207_vm1, %v870_v15, 0.0 }
 0x190   : > { %262 = vadd.xlane.f32.xlu0 %v261_v16 }
 0x1a6   : > { %451 = vrot.lane.b32.xlu0 %v204_v2, %s896_s22 }
 0x21d   : > { %v263_v20 = vpop.xlane.xlu0 %262 }
 0x21e   : > { %871 = vrcp.f32 %v263_v20 }
 0x221   : > { %v452_v27 = vpop.permute.xlu0 %451 }
 0x222   : > { %v457_v29 = vsel %vm207_vm1, %v452_v27, 0 }
 0x228   : > { %v872_v21 = vpop.eup %871 }
 0x229   : > { %v265_v23 = vmul.f32 %v872_v21, %v870_v15 }
 0x22b   : > { %v266_v25 = vpack.c.bf16 %v265_v23, %v265_v23 }
 0x22d   : > { %814 = vmatmul.mubr.msk.bf16.vlgmr.msra.gmra.mrb[0].mxu1 %vm207_vm1, %v266_v25 }
 0x22e   : > { %818 = vmatpush3.bf16.xpose.msra.mxu1 %v331_v24  ;;  %819 = vmatprep.mubr.msk.bf16.mxu1 %vm894_vm0, %v893_v0 }
 0x22f   : > { %829 = vmatprep.subr.bf16.mxu1 %v893_v0 }
 0x235   : > { %820 = vmatmul.mubr.msk.bf16.vlgmr.msra.gmra.mrb[4].mxu1 %vm207_vm1, %v323_v26 }
 0x236   : > { %830 = vmatpush3.bf16.xpose.msra.mxu1 %v457_v29  ;;  %831 = vmatprep.mubr.msk.bf16.mxu1 %vm894_vm0, %v893_v0 }
 0x237   : > { %841 = vmatprep.subr.bf16.mxu1 %v893_v0 }
 0x23d   : > { %832 = vmatmul.mubr.msk.bf16.vlgmr.msra.gmra.mrb[8].mxu1 %vm207_vm1, %v449_v28 }
 0x23e   : > { %842 = vmatpush3.bf16.xpose.msra.mxu1 %v583_v31  ;;  %843 = vmatprep.mubr.msk.bf16.mxu1 %vm894_vm0, %v893_v0 }
 0x245   : > { %844 = vmatmul.mubr.msk.bf16.vlgmr.msra.gmra.mrb[12].mxu1 %vm207_vm1, %v575_v32 }
 0x300   : > { %v308_v33 = vpop.f32.mrb[0].mxu1 }
 0x301   : > { %314 = vst.msk [vmem:[%s986_s29] sm:$0xff] %vm207_vm1, %v308_v33  ;;  %v815_v34 = vpop.f32.mrb[1].mxu1 }
 0x302   : > { %v311_v35 = vpop.f32.mrb[2].mxu1 }
 0x303   : > { %v816_v36 = vpop.f32.mrb[3].mxu1 }
 0x308   : > { %v367_v37 = vpop.f32.mrb[4].mxu1 }
 0x309   : > { %v373_v38 = vmul.f32 0.35355338, %v367_v37  ;;  %v821_v39 = vpop.f32.mrb[5].mxu1 }
 0x30a   : > { %v370_v40 = vpop.f32.mrb[6].mxu1 }
 0x30b   : > { %v822_v41 = vpop.f32.mrb[7].mxu1  ;;  %v374_v42 = vsel %vm207_vm1, %v373_v38, -inf }
 0x30c   : > { %375 = vmax.xlane.f32.xlu1 %v374_v42 }
 0x310   : > { %v493_v43 = vpop.f32.mrb[8].mxu1 }
 0x311   : > { %v499_v44 = vmul.f32 0.35355338, %v493_v43  ;;  %v833_v45 = vpop.f32.mrb[9].mxu1 }
 0x312   : > { %v496_v46 = vpop.f32.mrb[10].mxu1 }
 0x313   : > { %v500_v47 = vsel %vm207_vm1, %v499_v44, -inf  ;;  %v834_v48 = vpop.f32.mrb[11].mxu1 }
 0x314   : > { %501 = vmax.xlane.f32.xlu0 %v500_v47 }
 0x318   : > { %v619_v49 = vpop.f32.mrb[12].mxu1 }
 0x319   : > { %v625_v50 = vmul.f32 0.35355338, %v619_v49  ;;  %v845_v51 = vpop.f32.mrb[13].mxu1 }
 0x31a   : > { %v622_v52 = vpop.f32.mrb[14].mxu1 }
 0x31b   : > { %v626_v53 = vsel %vm207_vm1, %v625_v50, -inf  ;;  %v846_v54 = vpop.f32.mrb[15].mxu1 }
 0x31c   : > { %627 = vmax.xlane.f32.xlu1 %v626_v53 }
 0x399   : > { %v376_v55 = vpop.xlane.xlu1 %375 }
 0x39a   : > { %v377_v56 = vsub.f32 %v373_v38, %v376_v55 }
 0x39c   : > { %v378_v57 = vmul.f32 1.442695, %v377_v56 }
 0x39e   : > { %873 = vpow2.f32 %v378_v57 }
 0x3a1   : > { %v502_v58 = vpop.xlane.xlu0 %501 }
 0x3a2   : > { %v503_v59 = vsub.f32 %v499_v44, %v502_v58 }
 0x3a4   : > { %v504_v60 = vmul.f32 1.442695, %v503_v59 }
 0x3a6   : > { %875 = vpow2.f32 %v504_v60 }
 0x3a8   : > { %v874_v61 = vpop.eup %873 }
 0x3a9   : > { %v380_v62 = vsel %vm207_vm1, %v874_v61, 0.0  ;;  %v628_v2 = vpop.xlane.xlu1 %627 }
 0x3aa   : > { %381 = vadd.xlane.f32.xlu1 %v380_v62  ;;  %v629_v3 = vsub.f32 %v625_v50, %v628_v2 }
 0x3ac   : > { %v630_v4 = vmul.f32 1.442695, %v629_v3 }
 0x3ae   : > { %877 = vpow2.f32 %v630_v4 }
 0x3b0   : > { %v876_v63 = vpop.eup %875 }
 0x3b1   : > { %v506_v1 = vsel %vm207_vm1, %v876_v63, 0.0 }
 0x3b2   : > { %507 = vadd.xlane.f32.xlu0 %v506_v1 }
 0x3b8   : > { %v878_v5 = vpop.eup %877 }
 0x3b9   : > { %v632_v6 = vsel %vm207_vm1, %v878_v5, 0.0 }
 0x3bb   : > { %513 = vrot.lane.b32.xlu1 %v961_v18, %s896_s22 }
 0x3c8   : > { %387 = vrot.lane.b32.xlu0 %v961_v18, %s895_s21 }
 0x3df   : > { %633 = vadd.xlane.f32.xlu1 %v632_v6 }
 0x3f0   : > { %639 = vrot.lane.b32.xlu1 %v961_v18, %s897_s23 }
 0x437   : > { %v382_v7 = vpop.xlane.xlu1 %381 }
 0x438   : > { %879 = vrcp.f32 %v382_v7 }
 0x43b   : > { %v514_v13 = vpop.permute.xlu1 %513 }
 0x43c   : > { %v519_v15 = vsel %vm270_vm2, %v514_v13, 0 }
 0x43f   : > { %v508_v8 = vpop.xlane.xlu0 %507 }
 0x440   : > { %881 = vrcp.f32 %v508_v8 }
 0x442   : > { %v880_v9 = vpop.eup %879 }
 0x443   : > { %v384_v10 = vmul.f32 %v880_v9, %v874_v61  ;;  %v388_v11 = vpop.permute.xlu0 %387 }
 0x444   : > { %v393_v12 = vsel %vm270_vm2, %v388_v11, 0 }
 0x445   : > { %824 = vmatpush3.bf16.msra.mxu0 %v393_v12  ;;  %v385_v14 = vpack.c.bf16 %v384_v10, %v384_v10 }
 0x446   : > { %835 = vmatprep.subr.bf16.mxu0 %v893_v0 }
 0x448   : > { %826 = vmatmul.mubr.msk.bf16.vlgmr.msra.gmra.mrb[4].mxu0 %vm207_vm1, %v385_v14 }
 0x449   : > { %836 = vmatpush3.bf16.msra.mxu0 %v519_v15  ;;  %837 = vmatprep.mubr.msk.bf16.mxu0 %vm894_vm0, %v893_v0 }
 0x44a   : > { %v882_v16 = vpop.eup %881  ;;  %847 = vmatprep.subr.bf16.mxu0 %v893_v0 }
 0x44b   : > { %v510_v17 = vmul.f32 %v882_v16, %v876_v63 }
 0x44d   : > { %v511_v18 = vpack.c.bf16 %v510_v17, %v510_v17 }
 0x450   : > { %838 = vmatmul.mubr.msk.bf16.vlgmr.msra.gmra.mrb[8].mxu0 %vm207_vm1, %v511_v18 }
 0x451   : > { %849 = vmatprep.mubr.msk.bf16.mxu0 %vm894_vm0, %v893_v0 }
 0x46c   : > { %v634_v19 = vpop.xlane.xlu1 %633 }
 0x46d   : > { %883 = vrcp.f32 %v634_v19 }
 0x470   : > { %v640_v20 = vpop.permute.xlu1 %639 }
 0x471   : > { %v645_v21 = vsel %vm270_vm2, %v640_v20, 0 }
 0x472   : > { %848 = vmatpush3.bf16.msra.mxu0 %v645_v21 }
 0x477   : > { %v884_v22 = vpop.eup %883 }
 0x478   : > { %v636_v23 = vmul.f32 %v884_v22, %v878_v5 }
 0x47a   : > { %v637_v24 = vpack.c.bf16 %v636_v23, %v636_v23 }
 0x47c   : > { %850 = vmatmul.mubr.msk.bf16.vlgmr.msra.gmra.mrb[12].mxu0 %vm207_vm1, %v637_v24 }
 0x51b   : > { %v429_v25 = vpop.f32.mrb[4].mxu0 }
 0x51c   : > { %436 = vrot.lane.b32.xlu0 %v429_v25, %s898_s30  ;;  %v827_v26 = vpop.f32.mrb[5].mxu0 }
 0x51d   : > { %v432_v27 = vpop.f32.mrb[6].mxu0 }
 0x51e   : > { %v828_v28 = vpop.f32.mrb[7].mxu0 }
 0x523   : > { %v555_v29 = vpop.f32.mrb[8].mxu0 }
 0x524   : > { %562 = vrot.lane.b32.xlu1 %v555_v29, %s899_s4  ;;  %v839_v0 = vpop.f32.mrb[9].mxu0 }
 0x525   : > { %v558_v30 = vpop.f32.mrb[10].mxu0 }
 0x526   : > { %v840_v31 = vpop.f32.mrb[11].mxu0 }
 0x54f   : > { %v681_v32 = vpop.f32.mrb[12].mxu0 }
 0x550   : > { %688 = vrot.lane.b32.xlu0 %v681_v32, %s900_s5  ;;  %v851_v33 = vpop.f32.mrb[13].mxu0 }
 0x551   : > { %v684_v34 = vpop.f32.mrb[14].mxu0 }
 0x552   : > { %v852_v35 = vpop.f32.mrb[15].mxu0 }
 0x58e   : > { %v437_v36 = vpop.permute.xlu0 %436 }
 0x58f   : > { %440 = vst.msk [vmem:[%s986_s29] sm:$0xff] %vm439_vm3, %v437_v36 }
 0x596   : > { %v563_v37 = vpop.permute.xlu1 %562 }
 0x597   : > { %566 = vst.msk [vmem:[%s986_s29] sm:$0xff] %vm565_vm4, %v563_v37 }
 0x5c2   : > { %v689_v38 = vpop.permute.xlu0 %688 }
 0x5c3   : > { %692 = vst.msk [vmem:[%s986_s29] sm:$0xff] %vm691_vm5, %v689_v38 }
 0x5c4 PF: > { %s13_s12 = sadd.s32 1, %s891_s12  }
 0x5c5   : > { %p10_p4 = scmp.ge.s32.totalorder %s13_s12, 4  }
 0x5c7   :  { %12 = sbr.rel (!%p10_p4) target bundleno = 1 (0x1), region = 68 }

// kernel: transformer_forward.32
= control target key start
LH: loop header
LB: loop body
LE: loop exit
PB: predicated region body
PF: predicated region fallthrough
CT: control target
= control target key end

     0   :  { %v149_v0 = vmov 0.0   ;;  %vm150_vm0 = vmmov 0   ;;  %s234_s1 = inlined_call_operand.vmem [shape: f32[128,128], index: 1, kind: input, shape index: {}]   ;;  %s235_s0 = inlined_call_operand.vmem [shape: f32[16,128], index: 0, kind: input, shape index: {}]   ;;  %s236_s2 = inlined_call_operand.vmem [shape: f32[1,128], index: 2, kind: input, shape index: {}]   ;;  %s237_s3 = inlined_call_operand.vmem [shape: f32[16,128], index: 3, kind: output, shape index: {}]  }
   0x1   :  { %127 = vmatprep.subr.bf16.mxu0 %v149_v0  ;;  %v26_v1 = vld [vmem:[%s234_s1] sm:$0xff]  ;;  %v27_v2 = vld [vmem:[%s234_s1 + $0x8] sm:$0xff]  ;;  %v28_v3 = vld [vmem:[%s234_s1 + $0x10] sm:$0xff]  ;;  %143 = vmatprep.mubr.msk.bf16.mxu0 %vm150_vm0, %v149_v0 }
   0x2   :  { %v42_v4 = vpack.c.bf16 %v27_v2, %v26_v1  ;;  %v29_v5 = vld [vmem:[%s234_s1 + $0x18] sm:$0xff]  ;;  %v30_v7 = vld [vmem:[%s234_s1 + $0x20] sm:$0xff]  ;;  %v31_v8 = vld [vmem:[%s234_s1 + $0x28] sm:$0xff] }
   0x3   :  { %v43_v6 = vpack.c.bf16 %v29_v5, %v28_v3  ;;  %v44_v9 = vpack.c.bf16 %v31_v8, %v30_v7  ;;  %v32_v10 = vld [vmem:[%s234_s1 + $0x30] sm:$0xff]  ;;  %v33_v11 = vld [vmem:[%s234_s1 + $0x38] sm:$0xff]  ;;  %v34_v13 = vld [vmem:[%s234_s1 + $0x40] sm:$0xff] }
   0x4   :  { %128 = vmatpush3.bf16.msra.mxu0 %v42_v4  ;;  %v45_v12 = vpack.c.bf16 %v33_v11, %v32_v10  ;;  %v35_v14 = vld [vmem:[%s234_s1 + $0x48] sm:$0xff]  ;;  %v36_v16 = vld [vmem:[%s234_s1 + $0x50] sm:$0xff]  ;;  %v37_v17 = vld [vmem:[%s234_s1 + $0x58] sm:$0xff] }
   0x5   :  { %129 = vmatprep.subr.bf16.mxu0 %v149_v0  ;;  %v46_v15 = vpack.c.bf16 %v35_v14, %v34_v13  ;;  %v47_v18 = vpack.c.bf16 %v37_v17, %v36_v16  ;;  %v38_v19 = vld [vmem:[%s234_s1 + $0x60] sm:$0xff]  ;;  %v39_v20 = vld [vmem:[%s234_s1 + $0x68] sm:$0xff]  ;;  %v40_v22 = vld [vmem:[%s234_s1 + $0x70] sm:$0xff] }
   0x6   :  { %v48_v21 = vpack.c.bf16 %v39_v20, %v38_v19  ;;  %v41_v23 = vld [vmem:[%s234_s1 + $0x78] sm:$0xff]  ;;  %v23_v25 = vld [vmem:[%s235_s0] sm:$0xff]  ;;  %v24_v26 = vld [vmem:[%s235_s0 + $0x8] sm:$0xff] }
   0x7   :  { %v49_v24 = vpack.c.bf16 %v41_v23, %v40_v22  ;;  %v25_v27 = vpack.c.bf16 %v24_v26, %v23_v25  ;;  %v117_v28 = vld [vmem:[%s236_s2] ss:$0 sm:$0xff] }
   0x8   :  { %130 = vmatpush3.bf16.msra.mxu0 %v43_v6 }
   0x9   :  { %131 = vmatprep.subr.bf16.mxu0 %v149_v0 }
   0xc   :  { %132 = vmatpush3.bf16.msra.mxu0 %v44_v9 }
   0xd   :  { %133 = vmatprep.subr.bf16.mxu0 %v149_v0 }
  0x10   :  { %134 = vmatpush3.bf16.msra.mxu0 %v45_v12 }
  0x11   :  { %135 = vmatprep.subr.bf16.mxu0 %v149_v0 }
  0x14   :  { %136 = vmatpush3.bf16.msra.mxu0 %v46_v15 }
  0x15   :  { %137 = vmatprep.subr.bf16.mxu0 %v149_v0 }
  0x18   :  { %138 = vmatpush3.bf16.msra.mxu0 %v47_v18 }
  0x19   :  { %139 = vmatprep.subr.bf16.mxu0 %v149_v0 }
  0x1c   :  { %140 = vmatpush3.bf16.msra.mxu0 %v48_v21 }
  0x1d   :  { %141 = vmatprep.subr.bf16.mxu0 %v149_v0 }
  0x20   :  { %142 = vmatpush3.bf16.msra.mxu0 %v49_v24 }
  0x23   :  { %144 = vmatmul.mubr.bf16.vlgmr.msra.gmra.mrb[0].mxu0 %v25_v27 }
  0xf6   :  { %v84_v29 = vpop.f32.mrb[0].mxu0 }
  0xf7   :  { %v107_v30 = vadd.f32 %v117_v28, %v84_v29  ;;  %v145_v31 = vpop.f32.mrb[1].mxu0 }
  0xf8   :  { %v87_v32 = vpop.f32.mrb[2].mxu0 }
  0xf9   :  { %v109_v33 = vmax.f32 %v107_v30, 0.0  ;;  %v108_v34 = vadd.f32 %v117_v28, %v87_v32  ;;  %v146_v35 = vpop.f32.mrb[3].mxu0 }
  0xfb   :  { %111 = vst [vmem:[%s237_s3] sm:$0xff] %v109_v33  ;;  %v110_v36 = vmax.f32 %v108_v34, 0.0 }
  0xfd   :  { %112 = vst [vmem:[%s237_s3 + $0x8] sm:$0xff] %v110_v36 }

</bundles_post_ra>
